<compile_context>
chip_gen: v5e
topology: v5e:2x2
jax: 0.10.0
libtpu: 0.0.40
codegen_flags: <defaults>
</compile_context>

<pallas_src>
import jax
import jax.numpy as jnp
import numpy as np
from jax.experimental import pallas as pl
from jax.experimental.pallas import tpu as pltpu


def make_basicblock_kernel(NB, H, W, C):
    """NB images per block; activations are NHWC with C on the lane axis."""
    M = NB * H * W          # matmul rows (pixels)
    K = 3 * C               # dy-concatenated contraction depth
    N = 3 * C               # dx-concatenated output columns

    def kernel(xp_ref, w1_ref, b1_ref, w2_ref, b2_ref, res_ref, o_ref):
        # xp_ref : (NB, H+2, W, C)  bf16, rows 0 and H+1 are zero padding
        # w*_ref : (3C, 3C)         bf16, [dy*C+ci, dx*C+co] = scale-folded weight
        # b1_ref : (1, C)      f32  | b2_ref : (1, W*C) f32 (pre-tiled, lane-dense)
        # res_ref: (NB, H, W*C) f32 | o_ref : (NB, H, W*C) f32

        def conv3x3(xp, rhs):
            # dy K-concat: slab[n,h,w, dy*C+ci] = x[n, h+dy-1, w, ci]
            slab = jnp.concatenate(
                [xp[:, 0:H], xp[:, 1:H + 1], xp[:, 2:H + 2]], axis=-1)   # (NB,H,W,3C)
            # one MXU matmul: (M, 3C) x (3C, 3C) -> (M, 3C), f32 accumulate
            acc = jnp.dot(slab.reshape(M, K), rhs,
                          preferred_element_type=jnp.float32)
            acc = acc.reshape(NB, H, W, N)
            # dx N-concat combine: out[.,w] = P0[.,w-1] + P1[.,w] + P2[.,w+1]
            p0 = acc[..., 0:C]
            p1 = acc[..., C:2 * C]
            p2 = acc[..., 2 * C:3 * C]
            zcol = jnp.zeros((NB, H, 1, C), jnp.float32)
            left = jnp.concatenate([zcol, p0[:, :, :W - 1, :]], axis=2)
            right = jnp.concatenate([p2[:, :, 1:, :], zcol], axis=2)
            return p1 + left + right                                     # (NB,H,W,C) f32

        # ---- conv1 (+ folded BN1 bias) + ReLU
        y = conv3x3(xp_ref[...], w1_ref[...])
        y = jnp.maximum(y + b1_ref[...], 0.0).astype(jnp.bfloat16)       # (NB,H,W,C)

        # ---- conv2: row halo via leading-dim concat of a zero row (no scratch)
        zrow = jnp.zeros((NB, 1, W, C), jnp.bfloat16)
        yp = jnp.concatenate([zrow, y, zrow], axis=1)                    # (NB,H+2,W,C)
        y2 = conv3x3(yp, w2_ref[...])                                    # (NB,H,W,C) f32

        # ---- BN2 bias + exact-f32 residual + ReLU, all lane-dense (W*C lanes)
        out = (y2.reshape(NB * H, W * C)
               + b2_ref[...]
               + res_ref[...].reshape(NB * H, W * C))
        o_ref[...] = jnp.maximum(out, 0.0).reshape(NB, H, W * C).astype(o_ref.dtype)

    return kernel


def _fold_batch_into_one_block():
    """True on single-TensorCore chips (v5e / v6e): fold B into one grid step.
    On multi-TC chips (v7x, v4/v5p megacore) keep grid=(B,) 'parallel'."""
    try:
        kind = jax.devices()[0].device_kind.lower()
    except Exception:
        return False
    return any(t in kind for t in
               ("v5e", "v5 lite", "v5lite", "v6e", "v6 lite", "v6lite"))


def basicblock_pallas(x, w1, bn1, w2, bn2, eps=1e-5):
    """
    x        : (B, C, H, W) f32   NCHW (PyTorch convention)
    w1, w2   : (C, C, 3, 3) f32   conv weights, OIHW (bias=False)
    bn1, bn2 : tuples (gamma, beta, running_mean, running_var), each (C,)
    Implements the default BasicBlock config: stride=1, dilation=1, downsample=None.
    """
    B, C, H, W = x.shape
    C_out = w1.shape[0]
    assert C_out == C, "identity shortcut requires inplanes == planes"
    # TODO(synk): stride>1 / dilation>1 / downsample branch of BasicBlock not implemented.

    def fold_w(w, bn):
        g, b, m, v = bn
        s = g / jnp.sqrt(v + eps)                    # BN scale, folded into weights
        w_f = w * s[:, None, None, None]             # scale output channels (f32)
        # OIHW -> (KH, Cin, KW, Cout) -> (3*Cin, 3*Cout): rows = dy*C+ci, cols = dx*C+co
        rhs = jnp.transpose(w_f, (2, 1, 3, 0)).reshape(3 * C, 3 * C_out).astype(jnp.bfloat16)
        bias = (b - m * s).astype(jnp.float32)
        return rhs, bias

    rhs1, bias1 = fold_w(w1, bn1)
    rhs2, bias2 = fold_w(w2, bn2)
    bias1 = bias1.reshape(1, C_out)                              # pixel-rows broadcast
    bias2_ld = jnp.tile(bias2, W).reshape(1, W * C_out)          # lane-dense, pre-tiled

    # NCHW -> NHWC; bf16 conv input padded in H only; f32 lane-dense residual.
    x_nhwc = jnp.transpose(x, (0, 2, 3, 1))                      # (B,H,W,C) f32
    x_pad = jnp.pad(x_nhwc, ((0, 0), (1, 1), (0, 0), (0, 0))).astype(jnp.bfloat16)
    x_res = x_nhwc.reshape(B, H, W * C)                          # (B,H,W*C) f32

    # Chip-aware batch mapping.
    G = 1 if (B == 1 or _fold_batch_into_one_block()) else B
    NB = B // G

    kernel = make_basicblock_kernel(NB, H, W, C)

    out = pl.pallas_call(
        kernel,
        out_shape=jax.ShapeDtypeStruct((B, H, W * C_out), jnp.float32),
        grid=(G,),
        in_specs=[
            pl.BlockSpec((NB, H + 2, W, C), lambda g: (g, 0, 0, 0)),       # bf16 input
            pl.BlockSpec((3 * C, 3 * C_out), lambda g: (0, 0)),            # conv1 weights
            pl.BlockSpec((1, C_out), lambda g: (0, 0)),                    # bn1 bias
            pl.BlockSpec((3 * C, 3 * C_out), lambda g: (0, 0)),            # conv2 weights
            pl.BlockSpec((1, W * C_out), lambda g: (0, 0)),                # bn2 bias (tiled)
            pl.BlockSpec((NB, H, W * C), lambda g: (g, 0, 0)),             # f32 residual
        ],
        out_specs=pl.BlockSpec((NB, H, W * C_out), lambda g: (g, 0, 0)),
        compiler_params=pltpu.CompilerParams(
            dimension_semantics=("parallel",)),
    )(x_pad, rhs1, bias1, rhs2, bias2_ld, x_res)

    # (B, H, W*C) -> (B, C, H, W)
    return jnp.transpose(out.reshape(B, H, W, C_out), (0, 3, 1, 2))


def basicblock_reference(x, w1, bn1, w2, bn2, eps=1e-5):
    """Pure-JAX f32 reference matching the PyTorch forward (BN in eval mode)."""
    def conv(z, w):
        return jax.lax.conv_general_dilated(
            z, w, window_strides=(1, 1), padding=((1, 1), (1, 1)),
            dimension_numbers=("NCHW", "OIHW", "NCHW"))

    def bn(z, p):
        g, b, m, v = p
        s = g / jnp.sqrt(v + eps)
        return z * s[None, :, None, None] + (b - m * s)[None, :, None, None]

    out = jnp.maximum(bn(conv(x, w1), bn1), 0.0)
    out = bn(conv(out, w2), bn2)
    return jnp.maximum(out + x, 0.0)


if __name__ == "__main__":
    # BasicBlock-consistent small shapes: inplanes = planes = 32, 16x16 spatial, batch 2.
    B, C, H, W = 2, 32, 16, 16

    key = jax.random.PRNGKey(0)
    ks = jax.random.split(key, 11)

    x = jax.random.normal(ks[0], (B, C, H, W), dtype=jnp.float32)
    w1 = jax.random.normal(ks[1], (C, C, 3, 3), dtype=jnp.float32) * 0.1
    w2 = jax.random.normal(ks[2], (C, C, 3, 3), dtype=jnp.float32) * 0.1

    def rand_bn(k0, k1, k2, k3):
        gamma = 1.0 + 0.1 * jax.random.normal(k0, (C,), dtype=jnp.float32)
        beta = 0.1 * jax.random.normal(k1, (C,), dtype=jnp.float32)
        mean = 0.1 * jax.random.normal(k2, (C,), dtype=jnp.float32)
        var = 0.5 + jax.random.uniform(k3, (C,), dtype=jnp.float32)
        return (gamma, beta, mean, var)

    bn1 = rand_bn(ks[3], ks[4], ks[5], ks[6])
    bn2 = rand_bn(ks[7], ks[8], ks[9], ks[10])

    y = basicblock_pallas(x, w1, bn1, w2, bn2)
    y = jax.block_until_ready(y)

    y_ref = basicblock_reference(x, w1, bn1, w2, bn2)
    # Loose tolerance because the kernel feeds the MXU bf16 operands (f32 accumulate)
    # and stages the inter-conv activation in bf16; structural errors (wrong tap /
    # BN / missing residual) are O(1) and would still fail.
    np.testing.assert_allclose(np.asarray(y), np.asarray(y_ref),
                               rtol=5e-2, atol=1e-1)

    print("KERNEL_OK")
</pallas_src>

<mosaic_0001>
module attributes {stable_mosaic.version = 11 : i64} {
  func.func @kernel(%arg0: i32, %arg1: memref<1x18x16x32xbf16, #tpu.memory_space<vmem>>, %arg2: memref<96x96xbf16, #tpu.memory_space<vmem>>, %arg3: memref<1x32xf32, #tpu.memory_space<vmem>>, %arg4: memref<96x96xbf16, #tpu.memory_space<vmem>>, %arg5: memref<1x512xf32, #tpu.memory_space<vmem>>, %arg6: memref<1x16x512xf32, #tpu.memory_space<vmem>>, %arg7: memref<1x16x512xf32, #tpu.memory_space<vmem>>) attributes {dimension_semantics = [#tpu.dimension_semantics<parallel>], iteration_bounds = array<i64: 2>, scalar_prefetch = 0 : i64, scratch_operands = 0 : i64, tpu.core_type = #tpu.core_type<tc>, window_params = [{transform_indices = @transform_0, window_bounds = array<i64: 1, 18, 16, 32>}, {pipeline_mode = #tpu.pipeline_mode<synchronous>, transform_indices = @transform_1, window_bounds = array<i64: 96, 96>}, {pipeline_mode = #tpu.pipeline_mode<synchronous>, transform_indices = @transform_2, window_bounds = array<i64: 1, 32>}, {pipeline_mode = #tpu.pipeline_mode<synchronous>, transform_indices = @transform_3, window_bounds = array<i64: 96, 96>}, {pipeline_mode = #tpu.pipeline_mode<synchronous>, transform_indices = @transform_4, window_bounds = array<i64: 1, 512>}, {transform_indices = @transform_5, window_bounds = array<i64: 1, 16, 512>}, {transform_indices = @transform_6, window_bounds = array<i64: 1, 16, 512>}]} {
    %c0 = arith.constant 0 : index
    %c0_0 = arith.constant 0 : index
    %c0_1 = arith.constant 0 : index
    %c0_2 = arith.constant 0 : index
    %0 = vector.load %arg1[%c0, %c0_0, %c0_1, %c0_2] : memref<1x18x16x32xbf16, #tpu.memory_space<vmem>>, vector<1x18x16x32xbf16>
    %c0_3 = arith.constant 0 : index
    %c0_4 = arith.constant 0 : index
    %1 = vector.load %arg2[%c0_3, %c0_4] : memref<96x96xbf16, #tpu.memory_space<vmem>>, vector<96x96xbf16>
    %2 = vector.extract_strided_slice %0 {offsets = [0, 0, 0, 0], sizes = [1, 16, 16, 32], strides = [1, 1, 1, 1]} : vector<1x18x16x32xbf16> to vector<1x16x16x32xbf16>
    %3 = vector.extract_strided_slice %0 {offsets = [0, 1, 0, 0], sizes = [1, 16, 16, 32], strides = [1, 1, 1, 1]} : vector<1x18x16x32xbf16> to vector<1x16x16x32xbf16>
    %4 = vector.extract_strided_slice %0 {offsets = [0, 2, 0, 0], sizes = [1, 16, 16, 32], strides = [1, 1, 1, 1]} : vector<1x18x16x32xbf16> to vector<1x16x16x32xbf16>
    %5 = tpu.concatenate %2, %3, %4 in 3 : vector<1x16x16x32xbf16>, vector<1x16x16x32xbf16>, vector<1x16x16x32xbf16> -> vector<1x16x16x96xbf16>
    %6 = vector.shape_cast %5 : vector<1x16x16x96xbf16> to vector<256x96xbf16>
    %cst = arith.constant dense<0.000000e+00> : vector<256x96xf32>
    %7 = tpu.matmul %6, %1, %cst {dimension_numbers = #tpu.dot_dimension_numbers<[1], [0], [0], [1], [0, 0, 1, 1], [], []>} : vector<256x96xbf16>, vector<96x96xbf16>, vector<256x96xf32> -> vector<256x96xf32>
    %8 = vector.shape_cast %7 : vector<256x96xf32> to vector<1x16x16x96xf32>
    %9 = vector.extract_strided_slice %8 {offsets = [0, 0, 0, 0], sizes = [1, 16, 16, 32], strides = [1, 1, 1, 1]} : vector<1x16x16x96xf32> to vector<1x16x16x32xf32>
    %10 = vector.extract_strided_slice %8 {offsets = [0, 0, 0, 32], sizes = [1, 16, 16, 32], strides = [1, 1, 1, 1]} : vector<1x16x16x96xf32> to vector<1x16x16x32xf32>
    %11 = vector.extract_strided_slice %8 {offsets = [0, 0, 0, 64], sizes = [1, 16, 16, 32], strides = [1, 1, 1, 1]} : vector<1x16x16x96xf32> to vector<1x16x16x32xf32>
    %cst_5 = arith.constant 0.000000e+00 : f32
    %12 = vector.broadcast %cst_5 : f32 to vector<1x16x1x32xf32>
    %13 = vector.extract_strided_slice %9 {offsets = [0, 0, 0, 0], sizes = [1, 16, 15, 32], strides = [1, 1, 1, 1]} : vector<1x16x16x32xf32> to vector<1x16x15x32xf32>
    %14 = tpu.concatenate %12, %13 in 2 : vector<1x16x1x32xf32>, vector<1x16x15x32xf32> -> vector<1x16x16x32xf32>
    %15 = vector.extract_strided_slice %11 {offsets = [0, 0, 1, 0], sizes = [1, 16, 15, 32], strides = [1, 1, 1, 1]} : vector<1x16x16x32xf32> to vector<1x16x15x32xf32>
    %16 = tpu.concatenate %15, %12 in 2 : vector<1x16x15x32xf32>, vector<1x16x1x32xf32> -> vector<1x16x16x32xf32>
    %17 = arith.addf %10, %14 : vector<1x16x16x32xf32>
    %18 = arith.addf %17, %16 : vector<1x16x16x32xf32>
    %c0_6 = arith.constant 0 : index
    %c0_7 = arith.constant 0 : index
    %19 = vector.load %arg3[%c0_6, %c0_7] : memref<1x32xf32, #tpu.memory_space<vmem>>, vector<1x32xf32>
    %20 = vector.shape_cast %19 : vector<1x32xf32> to vector<1x1x1x32xf32>
    %21 = vector.broadcast %20 : vector<1x1x1x32xf32> to vector<1x16x16x32xf32>
    %22 = arith.addf %18, %21 : vector<1x16x16x32xf32>
    %cst_8 = arith.constant 0.000000e+00 : f32
    %23 = vector.broadcast %cst_8 : f32 to vector<1x16x16x32xf32>
    %24 = arith.maximumf %22, %23 : vector<1x16x16x32xf32>
    %25 = arith.truncf %24 : vector<1x16x16x32xf32> to vector<1x16x16x32xbf16>
    %cst_9 = arith.constant 0.000000e+00 : bf16
    %26 = vector.broadcast %cst_9 : bf16 to vector<1x1x16x32xbf16>
    %27 = tpu.concatenate %26, %25, %26 in 1 : vector<1x1x16x32xbf16>, vector<1x16x16x32xbf16>, vector<1x1x16x32xbf16> -> vector<1x18x16x32xbf16>
    %c0_10 = arith.constant 0 : index
    %c0_11 = arith.constant 0 : index
    %28 = vector.load %arg4[%c0_10, %c0_11] : memref<96x96xbf16, #tpu.memory_space<vmem>>, vector<96x96xbf16>
    %29 = vector.extract_strided_slice %27 {offsets = [0, 0, 0, 0], sizes = [1, 16, 16, 32], strides = [1, 1, 1, 1]} : vector<1x18x16x32xbf16> to vector<1x16x16x32xbf16>
    %30 = vector.extract_strided_slice %27 {offsets = [0, 1, 0, 0], sizes = [1, 16, 16, 32], strides = [1, 1, 1, 1]} : vector<1x18x16x32xbf16> to vector<1x16x16x32xbf16>
    %31 = vector.extract_strided_slice %27 {offsets = [0, 2, 0, 0], sizes = [1, 16, 16, 32], strides = [1, 1, 1, 1]} : vector<1x18x16x32xbf16> to vector<1x16x16x32xbf16>
    %32 = tpu.concatenate %29, %30, %31 in 3 : vector<1x16x16x32xbf16>, vector<1x16x16x32xbf16>, vector<1x16x16x32xbf16> -> vector<1x16x16x96xbf16>
    %33 = vector.shape_cast %32 : vector<1x16x16x96xbf16> to vector<256x96xbf16>
    %cst_12 = arith.constant dense<0.000000e+00> : vector<256x96xf32>
    %34 = tpu.matmul %33, %28, %cst_12 {dimension_numbers = #tpu.dot_dimension_numbers<[1], [0], [0], [1], [0, 0, 1, 1], [], []>} : vector<256x96xbf16>, vector<96x96xbf16>, vector<256x96xf32> -> vector<256x96xf32>
    %35 = vector.shape_cast %34 : vector<256x96xf32> to vector<1x16x16x96xf32>
    %36 = vector.extract_strided_slice %35 {offsets = [0, 0, 0, 0], sizes = [1, 16, 16, 32], strides = [1, 1, 1, 1]} : vector<1x16x16x96xf32> to vector<1x16x16x32xf32>
    %37 = vector.extract_strided_slice %35 {offsets = [0, 0, 0, 32], sizes = [1, 16, 16, 32], strides = [1, 1, 1, 1]} : vector<1x16x16x96xf32> to vector<1x16x16x32xf32>
    %38 = vector.extract_strided_slice %35 {offsets = [0, 0, 0, 64], sizes = [1, 16, 16, 32], strides = [1, 1, 1, 1]} : vector<1x16x16x96xf32> to vector<1x16x16x32xf32>
    %cst_13 = arith.constant 0.000000e+00 : f32
    %39 = vector.broadcast %cst_13 : f32 to vector<1x16x1x32xf32>
    %40 = vector.extract_strided_slice %36 {offsets = [0, 0, 0, 0], sizes = [1, 16, 15, 32], strides = [1, 1, 1, 1]} : vector<1x16x16x32xf32> to vector<1x16x15x32xf32>
    %41 = tpu.concatenate %39, %40 in 2 : vector<1x16x1x32xf32>, vector<1x16x15x32xf32> -> vector<1x16x16x32xf32>
    %42 = vector.extract_strided_slice %38 {offsets = [0, 0, 1, 0], sizes = [1, 16, 15, 32], strides = [1, 1, 1, 1]} : vector<1x16x16x32xf32> to vector<1x16x15x32xf32>
    %43 = tpu.concatenate %42, %39 in 2 : vector<1x16x15x32xf32>, vector<1x16x1x32xf32> -> vector<1x16x16x32xf32>
    %44 = arith.addf %37, %41 : vector<1x16x16x32xf32>
    %45 = arith.addf %44, %43 : vector<1x16x16x32xf32>
    %46 = vector.shape_cast %45 : vector<1x16x16x32xf32> to vector<16x512xf32>
    %c0_14 = arith.constant 0 : index
    %c0_15 = arith.constant 0 : index
    %47 = vector.load %arg5[%c0_14, %c0_15] : memref<1x512xf32, #tpu.memory_space<vmem>>, vector<1x512xf32>
    %48 = vector.broadcast %47 : vector<1x512xf32> to vector<16x512xf32>
    %49 = arith.addf %46, %48 : vector<16x512xf32>
    %c0_16 = arith.constant 0 : index
    %c0_17 = arith.constant 0 : index
    %c0_18 = arith.constant 0 : index
    %50 = vector.load %arg6[%c0_16, %c0_17, %c0_18] : memref<1x16x512xf32, #tpu.memory_space<vmem>>, vector<1x16x512xf32>
    %51 = vector.shape_cast %50 : vector<1x16x512xf32> to vector<16x512xf32>
    %52 = arith.addf %49, %51 : vector<16x512xf32>
    %cst_19 = arith.constant 0.000000e+00 : f32
    %53 = vector.broadcast %cst_19 : f32 to vector<16x512xf32>
    %54 = arith.maximumf %52, %53 : vector<16x512xf32>
    %55 = vector.shape_cast %54 : vector<16x512xf32> to vector<1x16x512xf32>
    %c0_20 = arith.constant 0 : index
    %c0_21 = arith.constant 0 : index
    %c0_22 = arith.constant 0 : index
    %56 = vector.load %arg7[%c0_20, %c0_21, %c0_22] : memref<1x16x512xf32, #tpu.memory_space<vmem>>, vector<1x16x512xf32>
    tpu.vector_store %arg7[%c0_20, %c0_21, %c0_22], %55 {strides = array<i32>} : memref<1x16x512xf32, #tpu.memory_space<vmem>>, vector<1x16x512xf32>,
    return
  }
  func.func @transform_0(%arg0: i32) -> (i32, i32, i32, i32) {
    %c0_i32 = arith.constant 0 : i32
    %c0_i32_0 = arith.constant 0 : i32
    %c0_i32_1 = arith.constant 0 : i32
    %c0_i32_2 = arith.constant 0 : i32
    return %arg0, %c0_i32, %c0_i32_0, %c0_i32_1 : i32, i32, i32, i32
  }
  func.func @transform_1(%arg0: i32) -> (i32, i32) {
    %c0_i32 = arith.constant 0 : i32
    %c0_i32_0 = arith.constant 0 : i32
    %c0_i32_1 = arith.constant 0 : i32
    return %c0_i32, %c0_i32_0 : i32, i32
  }
  func.func @transform_2(%arg0: i32) -> (i32, i32) {
    %c0_i32 = arith.constant 0 : i32
    %c0_i32_0 = arith.constant 0 : i32
    %c0_i32_1 = arith.constant 0 : i32
    return %c0_i32, %c0_i32_0 : i32, i32
  }
  func.func @transform_3(%arg0: i32) -> (i32, i32) {
    %c0_i32 = arith.constant 0 : i32
    %c0_i32_0 = arith.constant 0 : i32
    %c0_i32_1 = arith.constant 0 : i32
    return %c0_i32, %c0_i32_0 : i32, i32
  }
  func.func @transform_4(%arg0: i32) -> (i32, i32) {
    %c0_i32 = arith.constant 0 : i32
    %c0_i32_0 = arith.constant 0 : i32
    %c0_i32_1 = arith.constant 0 : i32
    return %c0_i32, %c0_i32_0 : i32, i32
  }
  func.func @transform_5(%arg0: i32) -> (i32, i32, i32) {
    %c0_i32 = arith.constant 0 : i32
    %c0_i32_0 = arith.constant 0 : i32
    %c0_i32_1 = arith.constant 0 : i32
    return %arg0, %c0_i32, %c0_i32_0 : i32, i32, i32
  }
  func.func @transform_6(%arg0: i32) -> (i32, i32, i32) {
    %c0_i32 = arith.constant 0 : i32
    %c0_i32_0 = arith.constant 0 : i32
    %c0_i32_1 = arith.constant 0 : i32
    return %arg0, %c0_i32, %c0_i32_0 : i32, i32, i32
  }
}

</mosaic_0001>

<bundles_post_ra>
// kernel: tpu_custom_call.1
= control target key start
LH: loop header
LB: loop body
LE: loop exit
PB: predicated region body
PF: predicated region fallthrough
CT: control target
= control target key end

     0   :  { %s5497_s0 = inlined_call_operand.hbm [shape: bf16[2,18,16,32], index: 0, kind: input, shape index: {}]   ;;  %s5498_s1 = inlined_call_operand.hbm [shape: bf16[96,96], index: 1, kind: input, shape index: {}]   ;;  %s5499_s2 = inlined_call_operand.vmem [shape: f32[1,32], index: 2, kind: input, shape index: {}]   ;;  %s5500_s3 = inlined_call_operand.hbm [shape: bf16[96,96], index: 3, kind: input, shape index: {}]   ;;  %s5501_s4 = inlined_call_operand.hbm [shape: f32[1,512], index: 4, kind: input, shape index: {}]   ;;  %s5502_s5 = inlined_call_operand.hbm [shape: f32[2,16,512], index: 5, kind: input, shape index: {}]   ;;  %s5503_s6 = inlined_call_operand.hbm [shape: f32[2,16,512], index: 6, kind: output, shape index: {}]  }
   0x1   :  { %5512 = sst [smem:[#allocation20_spill]] %s5497_s0 }
   0x2   :  { %5513 = sst [smem:[#allocation21_spill]] %s5498_s1 }
   0x3   :  { %5514 = sst [smem:[#allocation22_spill]] %s5500_s3 }
   0x4   :  { %5515 = sst [smem:[#allocation23_spill]] %s5501_s4 }
   0x5   :  { %11 = vsyncpa [#allocation3], 0 }
   0x6   :  { %13 = vsyncpa [#allocation3 + $0x1], 0 }
   0x7   :  { %14 = vsyncpa [#allocation6], 0 }
   0x8   :  { %15 = vsyncpa [#allocation9], 0 }
   0x9   :  { %16 = vsyncpa [#allocation4], 0 }
   0xa   :  { %18 = vsyncpa [#allocation4 + $0x1], 0  ;;  %s3770_s21 = smov 0   ;;  %s3772_s22 = smov 0  }
   0xb   :  { %s3774_s23 = smov 0   ;;  %s3776_s24 = smov 0  }
   0xc LB: > { %5516 = sst [smem:[#allocation17_spill]] %s3715_s23  ;;  %s3791_s25 = sadd.s32 4294967295, %s3719_s24   ;;  %s3719_s24 = sphi %s3776_s24, %s5536_s24   ;;  %s3715_s23 = sphi %s3774_s23, %s5538_s23   ;;  %s3711_s22 = sphi %s3772_s22, %s5540_s22   ;;  %s3707_s21 = sphi %s3770_s21, %s5539_s21  }
   0xd   : > { %s3177_s26 = sadd.s32 4294967294, %s3719_s24   ;;  %p44_p0 = scmp.ne.s32.totalorder %s3711_s22, %s3707_s21 }
   0xe   : > { %p5509_p1 = scmp.eq.s32.totalorder %s3791_s25, 0  ;;  %p178_p2 = scmp.eq.s32.totalorder %s3791_s25, 1 }
   0xf   : > { %p184_p3 = scmp.eq.s32.totalorder %s3177_s26, 1  ;;  %p3178_p5 = scmp.ge.s32.totalorder %s3719_s24, 1 }
  0x10   : > { %p3800_p4 = por %p5509_p1, %p44_p0  ;;  %p191_p7 = scmp.lt.s32.totalorder %s3719_s24, 3 }
  0x11   : > { %p3805_p6 = por %p184_p3, %p44_p0  ;;  %s5519_s1 = sld [smem:[#allocation21_spill]] }
  0x12   : > { %p3813_p8 = pnand %p3178_p5, %p191_p7  ;;  %s3721_s9 = smov [#allocation5]  }
  0x13   : > { %s204_s10 = sshll.u32 %s3721_s9, 4  ;;  %s3827_s12 = sadd.s32 1, %s3719_s24   ;;  %s205_s10 = int_to_ptr.vmem [resolvable:$true] %s204_s10 }
  0x14   : > { %p3415_p9 = pneg %p3813_p8  ;;  %5522 = sst [smem:[#allocation18_spill]] %s3827_s12 }
  0x15   : > { %s5504_s13 = smov 64   ;;  %s5506_s14 = smov 4  }
  0x16   : > { %p3821_p10 = pnand %p3415_p9, %p5509_p1  ;;  %s28_s15 = ssub.s32 %s3719_s24, %s3827_s12 }
  0x17   : > { %s202_s7 = sshll.u32 %s5519_s1, 4  ;;  %s31_s16 = sadd.s32 1, %s3715_s23  ;;  %s203_s7 = int_to_ptr.hbm [resolvable:$true] %s202_s7 }
  0x18   : > { %3418 = dma.hbm_to_vmem [thread:$0]  (!%p3821_p10), %s203_s7, 768, %s205_s10, [#allocation6], %s5504_s13, %s5504_s13, %s5506_s14  }
  0x19   : > { %p29_p12 = scmp.eq.s32.totalorder %s28_s15, 0  ;;  %p38_p13 = scmp.ne.s32.totalorder %s3715_s23, %s3711_s22 }
  0x1a   : > { %p39_p0 = scmp.eq.s32.totalorder %s3719_s24, 0  ;;  %p3439_p3 = scmp.lt.s32.totalorder %s3719_s24, 2 }
  0x1b   : > { %s3842_s17 = scalar_select %p29_p12, %s3715_s23, %s31_s16  }
  0x1c   : > { %p40_p5 = por %p39_p0, %p38_p13  ;;  %p3846_p7 = por %p178_p2, %p38_p13 }
  0x1d   : > { %5523 = sst [smem:[#allocation19_spill]] %s3842_s17  ;;  %s247_s19 = sand.u32 1, %s3719_s24  }
  0x1e   : > { %s249_s20 = sand.u32 1, %s3715_s23   ;;  %s3395_s29 = smul.u32 144, %s3719_s24 }
  0x1f   : > { %s3394_s26 = smul.u32 144, %s249_s20  ;;  %p3853_p9 = pnand %p3439_p3, %p40_p5 }
  0x20   : > { %s3857_s7 = sshll.u32 %s249_s20, 6  ;;  %s5526_s0 = sld [smem:[#allocation20_spill]] }
  0x21   : > { %s251_s16 = scalar_lea.vmem [#allocation2], %s3394_s26  ;;  %s3862_s1 = scalar_lea.sflag [#allocation3], %s247_s19 }
  0x22   : > { %s259_s13 = sshll.u32 %s251_s16, 4  ;;  %p3525_p12 = pneg %p3853_p9  ;;  %s260_s13 = int_to_ptr.vmem [resolvable:$true] %s259_s13 }
  0x26   : > { %s256_s15 = scalar_lea.hbm %s5526_s0, %s3395_s29  ;;  %s3528_s26 = scalar_lea.hbm %s5526_s0, 288 }
  0x27   : > { %s257_s14 = sshll.u32 %s256_s15, 4  ;;  %s258_s14 = int_to_ptr.hbm [resolvable:$true] %s257_s14 }
  0x28   : > { %s3521_s17 = sshra.s32 %s258_s14, 4  ;;  %s3522_s17 = int_to_ptr.hbm [resolvable:$true] %s3521_s17 }
  0x29   : > { %s3523_s23 = scalar_lea.hbm %s3522_s17, 144  ;;  %p3529_p3 = scmp.lt.s32.totalorder %s3522_s17, %s5526_s0 }
  0x2a   : > { %p3524_p2 = scmp.ne.s32.totalorder %s3522_s17, %s3523_s23  ;;  %p3530_p5 = scmp.lt.s32.totalorder %s3528_s26, %s3523_s23 }
  0x2c   : > { %p3526_p13 = pnand %p3525_p12, %p3524_p2  ;;  %p3531_p11 = por %p3530_p5, %p3529_p3 }
  0x2e   : > { %p3527_p0 = pneg %p3526_p13 }
  0x30   : > { %p3532_p1 = pnand %p3531_p11, %p3527_p0 }
  0x32   : > { %3535 = shalt.err (!%p3532_p1)
}
  0x33   : > { %s5527_s19 = smov 4   ;;  %s5528_s15 = smov 64  }
  0x34   : > { %3428 = dma.hbm_to_vmem [thread:$0]  (!%p3853_p9), %s258_s14, 2304, %s260_s13, %s3862_s1, %s5528_s15, %s5528_s15, %s5527_s19  }
  0x35   : > { %s5529_s3 = sld [smem:[#allocation22_spill]]  ;;  %s3724_s23 = smov [#allocation7]  }
  0x36   : > { %s221_s17 = sshll.u32 %s3724_s23, 4  ;;  %s5530_s4 = sld [smem:[#allocation23_spill]]  ;;  %s222_s17 = int_to_ptr.vmem [resolvable:$true] %s221_s17 }
  0x37   : > { %s3350_s13 = sshll.u32 %s3719_s24, 6  ;;  %s3725_s14 = smov [#allocation8]  }
  0x38   : > { %s236_s16 = sshll.u32 %s3725_s14, 4  ;;  %s273_s26 = scalar_lea.vmem [#allocation10], %s3857_s7  ;;  %s237_s16 = int_to_ptr.vmem [resolvable:$true] %s236_s16 }
  0x39   : > { %s281_s29 = sshll.u32 %s273_s26, 4  ;;  %s3618_s0 = scalar_lea.hbm %s5502_s5, 128  ;;  %s282_s29 = int_to_ptr.vmem [resolvable:$true] %s281_s29 }
  0x3b   : > { %s219_s9 = sshll.u32 %s5529_s3, 4  ;;  %s278_s3 = scalar_lea.hbm %s5502_s5, %s3350_s13  ;;  %s220_s9 = int_to_ptr.hbm [resolvable:$true] %s219_s9 }
  0x3c   : > { %s234_s10 = sshll.u32 %s5530_s4, 4  ;;  %s279_s23 = sshll.u32 %s278_s3, 4  ;;  %s235_s10 = int_to_ptr.hbm [resolvable:$true] %s234_s10  ;;  %s280_s23 = int_to_ptr.hbm [resolvable:$true] %s279_s23 }
  0x3d   : > { %3421 = dma.hbm_to_vmem [thread:$0]  (!%p3821_p10), %s220_s9, 768, %s222_s17, [#allocation6], %s5528_s15, %s5528_s15, %s5527_s19  }
  0x3e   : > { %3424 = dma.hbm_to_vmem [thread:$0]  (!%p3821_p10), %s235_s10, 64, %s237_s16, [#allocation9]  }
  0x3f   : > { %s3611_s4 = sshra.s32 %s280_s23, 4  ;;  %s3612_s4 = int_to_ptr.hbm [resolvable:$true] %s3611_s4 }
  0x40   : > { %s3613_s12 = scalar_lea.hbm %s3612_s4, 64  ;;  %p3619_p10 = scmp.lt.s32.totalorder %s3612_s4, %s5502_s5 }
  0x41   : > { %p3614_p1 = scmp.ne.s32.totalorder %s3612_s4, %s3613_s12  ;;  %p3620_p13 = scmp.lt.s32.totalorder %s3618_s0, %s3613_s12 }
  0x43   : > { %p3616_p11 = pnand %p3614_p1, %p3525_p12  ;;  %p3621_p0 = por %p3620_p13, %p3619_p10 }
  0x45   : > { %p3617_p2 = pneg %p3616_p11 }
  0x47   : > { %p3622_p3 = pnand %p3621_p0, %p3617_p2 }
  0x49   : > { %3625 = shalt.err (!%p3622_p3)
}
  0x4a   : > { %s3726_s11 = smov 512   ;;  %s3727_s7 = smov 32  }
  0x4b   : > { %3431 = dma.hbm_to_vmem [thread:$0]  (!%p3853_p9), %s280_s23, 1024, %s282_s29, %s3862_s1, %s3726_s11, %s3726_s11, %s3727_s7  }
  0x4c   : > { %293 = sbr.rel (%p3813_p8) target bundleno = 1501 (0x5dd), region = 44  ;;  %s295_s17 = sand.u32 (!%p3813_p8), 1, %s3791_s25  }
  0x4d   : > { %s3915_s10 = sand.u32 (!%p3813_p8), 1, %s3711_s22   ;;  %s296_s12 = scalar_lea.sflag (!%p3813_p8), [#allocation3], %s295_s17 }
  0x4e   : > { %s3396_s4 = smul.u32 (!%p3813_p8), 144, %s3915_s10 }
  0x50   : > { %s3918_s13 = scalar_lea.vmem (!%p3813_p8), [#allocation2], %s3396_s4 }
  0x51   : > { %3686 = dma.done.wait (%p3800_p4), %s296_s12, 2304  }
  0x52   : > { %3688 = vsyncadd (%p3800_p4), %s296_s12, 4294964992  ;;  %p5531_p9 = scmp.eq.s32.totalorder %s3791_s25, 0 }
  0x54   : > { %3690 = dma.done.wait (%p5531_p9), [#allocation6], 1536   ;;  %p5532_p8 = pmov %p5531_p9 }
  0x56   : > { %3692 = vsyncadd (%p5532_p8), [#allocation6], 4294965760  ;;  %p5533_p12 = pmov %p5532_p8 }
  0x57   : > { %p5534_p5 = pmov %p5532_p8 }
  0x58   : > { %3694 = dma.done.wait (%p5533_p12), [#allocation9], 64  }
  0x59   : > { %3696 = vsyncadd (%p5534_p5), [#allocation9], 4294967232  ;;  %s3191_s1 = sshll.u32 %s3915_s10, 6 }
  0x5a   : > { %s3935_s8 = scalar_lea.vmem [#allocation10], %s3191_s1 }
  0x5b   : > { %3698 = dma.done.wait (%p3800_p4), %s296_s12, 1024  }
  0x5c   : > { %3700 = vsyncadd (%p3800_p4), %s296_s12, 4294966272  ;;  %v3942_v0 = vld [vmem:[%s3918_s13 + $0x28] sm:$0xff]  ;;  %v3945_v1 = vld [vmem:[%s3918_s13 + $0x18] sm:$0xff]  ;;  %s3728_s30 = smov 32   ;;  %s3729_s27 = smov 64   ;;  %vm611_vm0 = vcmask 523264  }
  0x5d   : > { %v3948_v2 = vld [vmem:[%s3918_s13 + $0x8] sm:$0xff]  ;;  %501 = vrot.lane.b32.xlu2 %v3942_v0, %s3728_s30  ;;  %497 = vrot.lane.b32.xlu1 %v3945_v1, %s3728_s30  ;;  %v3957_v3 = vld [vmem:[%s3918_s13 + $0x20] sm:$0xff]  ;;  %vm562_vm1 = vcmask 261120   ;;  %vm680_vm2 = vcmask 785408   ;;  %vm834_vm3 = vcmask 1040384   ;;  %vm915_vm4 = vcmask 1046528  }
  0x5e   : > { %493 = vrot.lane.b32.xlu0 %v3948_v2, %s3728_s30  ;;  %v3960_v4 = vld [vmem:[%s3918_s13 + $0x10] sm:$0xff]  ;;  %v3969_v5 = vld [vmem:[%s3918_s13 + $0x38] sm:$0xff]  ;;  %v3972_v6 = vld [vmem:[%s3918_s13 + $0x40] sm:$0xff]  ;;  %s3730_s20 = smov 96   ;;  %vm2421_vm5 = vcmask 1047556   ;;  %s5417_s23 = scalar_lea.vmem [#allocation11], %s3191_s1 }
  0x5f   : > { %v3975_v7 = vld [vmem:[%s3918_s13 + $0x30] sm:$0xff]  ;;  %v3987_v9 = vld [vmem:[%s3918_s13 + $0x48] sm:$0xff]  ;;  %v3996_v10 = vld [vmem:[%s3918_s13 + $0x60] sm:$0xff]  ;;  %s3381_s26 = sshll.u32 %s3791_s25, 6  ;;  %s3052_s25 = sshll.u32 %s5417_s23, 4  ;;  %s3053_s25 = int_to_ptr.vmem [resolvable:$true] %s3052_s25 }
  0x60   : > { %v3984_v8 = vld [vmem:[%s3918_s13 + $0x50] sm:$0xff]  ;;  %v3999_v11 = vld [vmem:[%s3918_s13 + $0x68] sm:$0xff]  ;;  %v4002_v12 = vld [vmem:[%s3918_s13 + $0x58] sm:$0xff]  ;;  %s3051_s15 = scalar_lea.hbm %s5503_s6, %s3381_s26  ;;  %s3040_s9 = scalar_lea.sflag [#allocation4], %s3915_s10 }
  0x61   : > { %v4011_v13 = vld [vmem:[%s3918_s13 + $0x78] sm:$0xff]  ;;  %v4014_v14 = vld [vmem:[%s3918_s13 + $0x70] sm:$0xff]  ;;  %v3367_v15 = vld [vmem:[%s3918_s13 + $0x80] sm:$0xff]  ;;  %s3054_s0 = sshll.u32 %s3051_s15, 4  ;;  %s3661_s4 = scalar_lea.hbm %s5503_s6, 128  ;;  %s3055_s0 = int_to_ptr.hbm [resolvable:$true] %s3054_s0 }
  0x62   : > { %v3374_v16 = vld [vmem:[#allocation5 + $0x28] sm:$0xff]  ;;  %v3373_v17 = vld [vmem:[#allocation5 + $0x20] sm:$0xff]  ;;  %v3372_v18 = vld [vmem:[#allocation5 + $0x18] sm:$0xff]  ;;  %s3655_s3 = sshra.s32 %s3055_s0, 4  ;;  %s3656_s3 = int_to_ptr.hbm [resolvable:$true] %s3655_s3 }
  0x63   : > { %715 = vmatpush.bf16.msra.mxu0 %v3374_v16  ;;  %3382 = vmatpush.bf16.msra.mxu2 %v3374_v16  ;;  %v3371_v19 = vld [vmem:[#allocation5 + $0x10] sm:$0xff]  ;;  %v3370_v20 = vld [vmem:[#allocation5 + $0x8] sm:$0xff]  ;;  %v3369_v22 = vld [vmem:[#allocation5] sm:$0xff]  ;;  %s3657_s11 = scalar_lea.hbm %s3656_s3, 64  ;;  %p3662_p2 = scmp.lt.s32.totalorder %s3656_s3, %s5503_s6 }
  0x64   : > { %v3368_v21 = vld [vmem:[%s3918_s13 + $0x88] sm:$0xff]  ;;  %v3351_v26 = vld [vmem:[%s3918_s13] sm:$0xff]  ;;  %p3658_p4 = scmp.ne.s32.totalorder %s3656_s3, %s3657_s11  ;;  %p3663_p10 = scmp.lt.s32.totalorder %s3661_s4, %s3657_s11 }
  0x65   : > { %499 = vrot.lane.b32.xlu1 %v3957_v3, %s3728_s30  ;;  %530 = vrot.lane.b32.xlu2 %v3960_v4, %s3729_s27 }
  0x66   : > { %495 = vrot.lane.b32.xlu0 %v3960_v4, %s3728_s30  ;;  %p3659_p1 = pnand %p3658_p4, %p3846_p7  ;;  %p3664_p13 = por %p3663_p10, %p3662_p2 }
  0x67   : > { %716 = vmatpush.bf16.msra.mxu0 %v3373_v17  ;;  %3383 = vmatpush.bf16.msra.mxu2 %v3373_v17 }
  0x68   : > { %p3660_p11 = pneg %p3659_p1 }
  0x6a   : > { %p3665_p0 = pnand %p3664_p13, %p3660_p11 }
  0x6b   : > { %717 = vmatpush.bf16.msra.mxu0 %v3372_v18  ;;  %3384 = vmatpush.bf16.msra.mxu2 %v3372_v18 }
  0x6d   : > { %505 = vrot.lane.b32.xlu1 %v3969_v5, %s3728_s30  ;;  %507 = vrot.lane.b32.xlu2 %v3972_v6, %s3728_s30 }
  0x6e   : > { %503 = vrot.lane.b32.xlu0 %v3975_v7, %s3728_s30 }
  0x6f   : > { %718 = vmatpush.bf16.msra.mxu0 %v3371_v19  ;;  %3385 = vmatpush.bf16.msra.mxu2 %v3371_v19 }
  0x73   : > { %719 = vmatpush.bf16.msra.mxu0 %v3370_v20  ;;  %3386 = vmatpush.bf16.msra.mxu2 %v3370_v20 }
  0x75   : > { %511 = vrot.lane.b32.xlu1 %v3984_v8, %s3728_s30  ;;  %532 = vrot.lane.b32.xlu2 %v3945_v1, %s3729_s27 }
  0x76   : > { %509 = vrot.lane.b32.xlu0 %v3987_v9, %s3728_s30 }
  0x77   : > { %720 = vmatpush.bf16.msra.mxu0 %v3369_v22  ;;  %3387 = vmatpush.bf16.msra.mxu2 %v3369_v22 }
  0x7d   : > { %515 = vrot.lane.b32.xlu1 %v3996_v10, %s3728_s30  ;;  %517 = vrot.lane.b32.xlu2 %v3999_v11, %s3728_s30 }
  0x7e   : > { %513 = vrot.lane.b32.xlu0 %v4002_v12, %s3728_s30 }
  0x85   : > { %534 = vrot.lane.b32.xlu1 %v3957_v3, %s3729_s27  ;;  %521 = vrot.lane.b32.xlu2 %v4011_v13, %s3728_s30 }
  0x86   : > { %519 = vrot.lane.b32.xlu0 %v4014_v14, %s3728_s30 }
  0x8d   : > { %536 = vrot.lane.b32.xlu1 %v3942_v0, %s3729_s27  ;;  %538 = vrot.lane.b32.xlu2 %v3975_v7, %s3729_s27 }
  0x8e   : > { %523 = vrot.lane.b32.xlu0 %v3367_v15, %s3728_s30 }
  0x95   : > { %542 = vrot.lane.b32.xlu1 %v3972_v6, %s3729_s27  ;;  %546 = vrot.lane.b32.xlu2 %v3984_v8, %s3729_s27 }
  0x96   : > { %540 = vrot.lane.b32.xlu0 %v3969_v5, %s3729_s27 }
  0x9d   : > { %548 = vrot.lane.b32.xlu1 %v4002_v12, %s3729_s27  ;;  %550 = vrot.lane.b32.xlu2 %v3996_v10, %s3729_s27 }
  0x9e   : > { %544 = vrot.lane.b32.xlu0 %v3987_v9, %s3729_s27 }
  0xa5   : > { %554 = vrot.lane.b32.xlu1 %v4014_v14, %s3729_s27  ;;  %556 = vrot.lane.b32.xlu2 %v4011_v13, %s3729_s27 }
  0xa6   : > { %552 = vrot.lane.b32.xlu0 %v3999_v11, %s3729_s27 }
  0xad   : > { %560 = vrot.lane.b32.xlu1 %v3368_v21, %s3729_s27 }
  0xae   : > { %558 = vrot.lane.b32.xlu0 %v3367_v15, %s3729_s27 }
  0xb7   : > { %v502_v23 = vpop.permute.xlu2 %501 }
  0xb8   : > { %v577_v60 = vsel %vm562_vm1, %v3957_v3, %v502_v23 }
  0xbf   : > { %v531_v24 = vpop.permute.xlu2 %530 }
  0xc7   : > { %v4049_v25 = vpop.permute.xlu2 %507 }
  0xcf   : > { %v498_v27 = vpop.permute.xlu1 %497  ;;  %v533_v28 = vpop.permute.xlu2 %532 }
  0xd0   : > { %v494_v29 = vpop.permute.xlu0 %493  ;;  %v571_v47 = vsel %vm562_vm1, %v3960_v4, %v498_v27 }
  0xd1   : > { %v565_v30 = vsel %vm562_vm1, %v3351_v26, %v494_v29 }
  0xd2   : > { %v613_v31 = vsel %vm611_vm0, %v565_v30, %v531_v24 }
  0xd3   : > { %3289 = vmatmul.msk.bf16.vlgmr.msra.gmra.mxu0 %vm680_vm2, %v613_v31 }
  0xd7   : > { %v500_v32 = vpop.permute.xlu1 %499  ;;  %v518_v33 = vpop.permute.xlu2 %517 }
  0xd8   : > { %v496_v34 = vpop.permute.xlu0 %495  ;;  %v574_v53 = vsel %vm562_vm1, %v3945_v1, %v500_v32 }
  0xd9   : > { %v568_v35 = vsel %vm562_vm1, %v3948_v2, %v496_v34 }
  0xda   : > { %v615_v39 = vsel %vm611_vm0, %v568_v35, %v533_v28 }
  0xdf   : > { %v506_v36 = vpop.permute.xlu1 %505  ;;  %v4057_v37 = vpop.permute.xlu2 %521 }
  0xe0   : > { %v504_v38 = vpop.permute.xlu0 %503  ;;  %v607_v30 = vsel %vm562_vm1, %v4014_v14, %v4057_v37 }
  0xe3   : > { %3290 = vmatmul.msk.bf16.gmra.mxu0 %vm680_vm2, %v615_v39 }
  0xe7   : > { %v512_v40 = vpop.permute.xlu1 %511  ;;  %v539_v41 = vpop.permute.xlu2 %538 }
  0xe8   : > { %v510_v42 = vpop.permute.xlu0 %509  ;;  %v592_v56 = vsel %vm562_vm1, %v3987_v9, %v512_v40  ;;  %v621_v61 = vsel %vm611_vm0, %v577_v60, %v539_v41 }
  0xe9   : > { %v589_v43 = vsel %vm562_vm1, %v3972_v6, %v510_v42  ;;  %v580_v6 = vsel %vm562_vm1, %v3942_v0, %v504_v38  ;;  %v3490_v0 = vld [vmem:[%s5499_s2] ss:$0 sm:$0xff] }
  0xea   : > { %1287 = vrot.lane.b32.xlu0 %v3490_v0, %s3728_s30 }
  0xef   : > { %v516_v44 = vpop.permute.xlu1 %515  ;;  %v547_v45 = vpop.permute.xlu2 %546 }
  0xf0   : > { %v629_v46 = vsel %vm611_vm0, %v589_v43, %v547_v45  ;;  %v514_v50 = vpop.permute.xlu0 %513  ;;  %v598_v15 = vsel %vm562_vm1, %v4002_v12, %v516_v44  ;;  %v601_v12 = vsel %vm562_vm1, %v3996_v10, %v518_v33 }
  0xf1   : > { %3297 = vmatmul.msk.bf16.vlgmr.msra.gmra.mxu2 %vm680_vm2, %v629_v46  ;;  %v595_v63 = vsel %vm562_vm1, %v3984_v8, %v514_v50  ;;  %v583_v8 = vsel %vm562_vm1, %v3975_v7, %v506_v36  ;;  %v586_v7 = vsel %vm562_vm1, %v3969_v5, %v4049_v25 }
  0xf7   : > { %v535_v48 = vpop.permute.xlu1 %534  ;;  %v551_v1 = vpop.permute.xlu2 %550 }
  0xf8   : > { %v617_v49 = vsel %vm611_vm0, %v571_v47, %v535_v48  ;;  %v520_v52 = vpop.permute.xlu0 %519  ;;  %v633_v2 = vsel %vm611_vm0, %v595_v63, %v551_v1 }
  0xf9   : > { %3291 = vmatmul.msk.bf16.gmra.mxu0 %vm680_vm2, %v617_v49  ;;  %v604_v21 = vsel %vm562_vm1, %v3999_v11, %v520_v52 }
  0xff   : > { %v537_v51 = vpop.permute.xlu1 %536  ;;  %v557_v22 = vpop.permute.xlu2 %556 }
 0x100   : > { %v619_v55 = vsel %vm611_vm0, %v574_v53, %v537_v51  ;;  %v524_v57 = vpop.permute.xlu0 %523  ;;  %v639_v10 = vsel %vm611_vm0, %v604_v21, %v557_v22 }
 0x101   : > { %v610_v32 = vsel %vm562_vm1, %v4011_v13, %v524_v57 }
 0x107   : > { %v543_v54 = vpop.permute.xlu1 %542 }
 0x108   : > { %v541_v62 = vpop.permute.xlu0 %540  ;;  %v625_v17 = vsel %vm611_vm0, %v583_v8, %v543_v54 }
 0x109   : > { %3292 = vmatmul.msk.bf16.gmra.mxu0 %vm680_vm2, %v619_v55  ;;  %v623_v9 = vsel %vm611_vm0, %v580_v6, %v541_v62 }
 0x10f   : > { %v549_v58 = vpop.permute.xlu1 %548 }
 0x110   : > { %v631_v59 = vsel %vm611_vm0, %v592_v56, %v549_v58  ;;  %v545_v4 = vpop.permute.xlu0 %544 }
 0x111   : > { %3298 = vmatmul.msk.bf16.gmra.mxu2 %vm680_vm2, %v631_v59  ;;  %v627_v20 = vsel %vm611_vm0, %v586_v7, %v545_v4 }
 0x117   : > { %v555_v18 = vpop.permute.xlu1 %554 }
 0x118   : > { %v553_v3 = vpop.permute.xlu0 %552  ;;  %v637_v19 = vsel %vm611_vm0, %v601_v12, %v555_v18 }
 0x119   : > { %3293 = vmatmul.msk.bf16.gmra.mxu0 %vm680_vm2, %v621_v61  ;;  %v635_v16 = vsel %vm611_vm0, %v598_v15, %v553_v3 }
 0x11f   : > { %v561_v33 = vpop.permute.xlu1 %560 }
 0x120   : > { %v559_v29 = vpop.permute.xlu0 %558  ;;  %v643_v34 = vsel %vm611_vm0, %v610_v32, %v561_v33 }
 0x121   : > { %3299 = vmatmul.msk.bf16.gmra.mxu2 %vm680_vm2, %v633_v2  ;;  %v641_v31 = vsel %vm611_vm0, %v607_v30, %v559_v29 }
 0x129   : > { %3294 = vmatmul.msk.bf16.gmra.mxu0 %vm680_vm2, %v623_v9 }
 0x131   : > { %3300 = vmatmul.msk.bf16.gmra.mxu2 %vm680_vm2, %v635_v16 }
 0x139   : > { %3295 = vmatmul.msk.bf16.gmra.mxu0 %vm680_vm2, %v625_v17 }
 0x141   : > { %3301 = vmatmul.msk.bf16.gmra.mxu2 %vm680_vm2, %v637_v19 }
 0x149   : > { %3296 = vmatmul.msk.bf16.gmra.mxu0 %vm680_vm2, %v627_v20 }
 0x150   : > { %v4112_v23 = vpop.f32.mrf.mxu0 }
 0x151   : > { %v835_v24 = vrot.slane %v4112_v23, 7  ;;  %3302 = vmatmul.msk.bf16.gmra.mxu2 %vm680_vm2, %v639_v10  ;;  %v916_v25 = vrot.slane %v4112_v23, 1 }
 0x153   : > { %v899_v26 = vsel %vm834_vm3, 0.0, %v835_v24 }
 0x154   : > { %1012 = vrot.lane.b32.xlu2 %v899_v26, %s3728_s30 }
 0x158   : > { %v4119_v5 = vpop.f32.mrf.mxu0 }
 0x159   : > { %v917_v11 = vrot.slane %v4119_v5, 1  ;;  %v836_v37 = vrot.slane %v4119_v5, 7 }
 0x15b   : > { %v980_v27 = vsel %vm915_vm4, %v917_v11, 0.0  ;;  %v918_v28 = vsel %vm915_vm4, %v916_v25, %v917_v11  ;;  %v837_v44 = vsel %vm834_vm3, %v835_v24, %v836_v37 }
 0x15c   : > { %1158 = vrot.lane.b32.xlu2 %v980_v27, %s3730_s20  ;;  %1156 = vrot.lane.b32.xlu1 %v918_v28, %s3730_s20 }
 0x160   : > { %v4147_v41 = vpop.f32.mrf.mxu0 }
 0x161   : > { %3303 = vmatmul.msk.bf16.gmra.mxu2 %vm680_vm2, %v641_v31  ;;  %v838_v45 = vrot.slane %v4147_v41, 7  ;;  %v919_v50 = vrot.slane %v4147_v41, 1 }
 0x163   : > { %v900_v46 = vsel %vm834_vm3, 0.0, %v838_v45 }
 0x168   : > { %v4157_v47 = vpop.f32.mrf.mxu0 }
 0x169   : > { %v920_v49 = vrot.slane %v4157_v47, 1  ;;  %v839_v57 = vrot.slane %v4157_v47, 7 }
 0x16b   : > { %v981_v51 = vsel %vm915_vm4, %v920_v49, 0.0  ;;  %v921_v52 = vsel %vm915_vm4, %v919_v50, %v920_v49  ;;  %v840_v1 = vsel %vm834_vm3, %v838_v45, %v839_v57 }
 0x171   : > { %3304 = vmatmul.msk.bf16.gmra.mxu2 %vm680_vm2, %v643_v34 }
 0x174   : > { %v4136_v35 = vpop.f32.mrf.mxu2 }
 0x175   : > { %v859_v36 = vrot.slane %v4136_v35, 7  ;;  %v940_v14 = vrot.slane %v4136_v35, 1 }
 0x176   : > { %v4173_v56 = vpop.f32.mrf.mxu0 }
 0x177   : > { %v907_v38 = vsel %vm834_vm3, 0.0, %v859_v36  ;;  %v841_v2 = vrot.slane %v4173_v56, 7  ;;  %v922_v18 = vrot.slane %v4173_v56, 1 }
 0x178   : > { %1044 = vrot.lane.b32.xlu0 %v907_v38, %s3728_s30 }
 0x179   : > { %v901_v15 = vsel %vm834_vm3, 0.0, %v841_v2 }
 0x17c   : > { %v4143_v39 = vpop.f32.mrf.mxu2 }
 0x17d   : > { %v860_v13 = vrot.slane %v4143_v39, 7  ;;  %v941_v40 = vrot.slane %v4143_v39, 1 }
 0x17e   : > { %v4188_v4 = vpop.f32.mrf.mxu0 }
 0x17f   : > { %v942_v42 = vsel %vm915_vm4, %v940_v14, %v941_v40  ;;  %v861_v43 = vsel %vm834_vm3, %v859_v36, %v860_v13  ;;  %v988_v48 = vsel %vm915_vm4, %v941_v40, 0.0  ;;  %v842_v8 = vrot.slane %v4188_v4, 7 }
 0x180   : > { %1188 = vrot.lane.b32.xlu2 %v942_v42, %s3730_s20  ;;  %1046 = vrot.lane.b32.xlu1 %v861_v43, %s3728_s30  ;;  %v923_v17 = vrot.slane %v4188_v4, 1 }
 0x181   : > { %1014 = vrot.lane.b32.xlu0 %v837_v44, %s3728_s30  ;;  %v843_v7 = vsel %vm834_vm3, %v841_v2, %v842_v8 }
 0x182   : > { %v982_v19 = vsel %vm915_vm4, %v923_v17, 0.0  ;;  %v924_v20 = vsel %vm915_vm4, %v922_v18, %v923_v17 }
 0x186   : > { %v4204_v12 = vpop.f32.mrf.mxu0 }
 0x187   : > { %v844_v30 = vrot.slane %v4204_v12, 7  ;;  %v925_v31 = vrot.slane %v4204_v12, 1 }
 0x188   : > { %1016 = vrot.lane.b32.xlu1 %v900_v46, %s3728_s30 }
 0x189   : > { %1190 = vrot.lane.b32.xlu0 %v988_v48, %s3730_s20  ;;  %v902_v36 = vsel %vm834_vm3, 0.0, %v844_v30 }
 0x18e   : > { %v4219_v11 = vpop.f32.mrf.mxu0 }
 0x18f   : > { %v926_v28 = vrot.slane %v4219_v11, 1  ;;  %v845_v14 = vrot.slane %v4219_v11, 7 }
 0x190   : > { %1162 = vrot.lane.b32.xlu1 %v981_v51, %s3730_s20 }
 0x191   : > { %1160 = vrot.lane.b32.xlu0 %v921_v52, %s3730_s20  ;;  %v927_v34 = vsel %vm915_vm4, %v925_v31, %v926_v28  ;;  %v846_v40 = vsel %vm834_vm3, %v844_v30, %v845_v14  ;;  %v983_v43 = vsel %vm915_vm4, %v926_v28, 0.0 }
 0x194   : > { %v4168_v53 = vpop.f32.mrf.mxu2 }
 0x195   : > { %v862_v54 = vrot.slane %v4168_v53, 7  ;;  %v943_v59 = vrot.slane %v4168_v53, 1 }
 0x196   : > { %v4237_v38 = vpop.f32.mrf.mxu0 }
 0x197   : > { %v908_v55 = vsel %vm834_vm3, 0.0, %v862_v54  ;;  %v847_v44 = vrot.slane %v4237_v38, 7  ;;  %v928_v57 = vrot.slane %v4237_v38, 1 }
 0x198   : > { %1048 = vrot.lane.b32.xlu2 %v908_v55, %s3728_s30 }
 0x199   : > { %v903_v50 = vsel %vm834_vm3, 0.0, %v847_v44 }
 0x19c   : > { %v4176_v58 = vpop.f32.mrf.mxu2 }
 0x19d   : > { %v863_v60 = vrot.slane %v4176_v58, 7  ;;  %v944_v61 = vrot.slane %v4176_v58, 1 }
 0x19e   : > { %v4251_v46 = vpop.f32.mrf.mxu0 }
 0x19f   : > { %v945_v62 = vsel %vm915_vm4, %v943_v59, %v944_v61  ;;  %v864_v63 = vsel %vm834_vm3, %v862_v54, %v863_v60  ;;  %v989_v16 = vsel %vm915_vm4, %v944_v61, 0.0  ;;  %v929_v54 = vrot.slane %v4251_v46, 1 }
 0x1a0   : > { %1192 = vrot.lane.b32.xlu1 %v945_v62, %s3730_s20  ;;  %1050 = vrot.lane.b32.xlu0 %v864_v63, %s3728_s30 }
 0x1a1   : > { %1018 = vrot.lane.b32.xlu2 %v840_v1, %s3728_s30  ;;  %v984_v60 = vsel %vm915_vm4, %v929_v54, 0.0  ;;  %v930_v61 = vsel %vm915_vm4, %v928_v57, %v929_v54 }
 0x1a4   : > { %v4190_v6 = vpop.f32.mrf.mxu2 }
 0x1a5   : > { %v865_v9 = vrot.slane %v4190_v6, 7  ;;  %v946_v24 = vrot.slane %v4190_v6, 1 }
 0x1a6   : > { %v4265_v59 = vpop.f32.mrf.mxu0 }
 0x1a7   : > { %v909_v3 = vsel %vm834_vm3, 0.0, %v865_v9 }
 0x1a8   : > { %1052 = vrot.lane.b32.xlu1 %v909_v3, %s3728_s30  ;;  %1020 = vrot.lane.b32.xlu0 %v901_v15, %s3728_s30 }
 0x1a9   : > { %1194 = vrot.lane.b32.xlu2 %v989_v16, %s3730_s20 }
 0x1ac   : > { %v4201_v0 = vpop.f32.mrf.mxu2 }
 0x1ad   : > { %v947_v21 = vrot.slane %v4201_v0, 1  ;;  %v866_v22 = vrot.slane %v4201_v0, 7 }
 0x1ae   : > { %v4269_v62 = vpop.permute.xlu2 %1012  ;;  %v4283_v17 = vpop.f32.mrf.mxu0 }
 0x1af   : > { %v948_v26 = vsel %vm915_vm4, %v946_v24, %v947_v21  ;;  %v990_v25 = vsel %vm915_vm4, %v947_v21, 0.0  ;;  %v867_v27 = vsel %vm834_vm3, %v865_v9, %v866_v22  ;;  %v848_v9 = vrot.slane %v4251_v46, 7  ;;  %v4293_v21 = vpop.permute.xlu0 %1287 }
 0x1b0   : > { %1166 = vrot.lane.b32.xlu0 %v982_v19, %s3730_s20  ;;  %1022 = vrot.lane.b32.xlu1 %v843_v7, %s3728_s30  ;;  %v850_v7 = vrot.slane %v4265_v59, 7  ;;  %v932_v30 = vrot.slane %v4283_v17, 1 }
 0x1b1   : > { %1164 = vrot.lane.b32.xlu2 %v924_v20, %s3730_s20  ;;  %v849_v18 = vsel %vm834_vm3, %v847_v44, %v848_v9 }
 0x1b4   : > { %v4214_v10 = vpop.f32.mrf.mxu2 }
 0x1b5   : > { %v868_v29 = vrot.slane %v4214_v10, 7  ;;  %v949_v48 = vrot.slane %v4214_v10, 1 }
 0x1b6   : > { %v4289_v19 = vpop.permute.xlu2 %1158 }
 0x1b7   : > { %v910_v33 = vsel %vm834_vm3, 0.0, %v868_v29 }
 0x1b8   : > { %1196 = vrot.lane.b32.xlu0 %v948_v26, %s3730_s20  ;;  %1198 = vrot.lane.b32.xlu1 %v990_v25, %s3730_s20  ;;  %v904_v26 = vsel %vm834_vm3, 0.0, %v850_v7 }
 0x1b9   : > { %1054 = vrot.lane.b32.xlu2 %v867_v27, %s3728_s30  ;;  %v4303_v27 = vpop.f32.mrf.mxu0 }
 0x1ba   : > { %v934_v9 = vrot.slane %v4303_v27, 1 }
 0x1bc   : > { %v4229_v32 = vpop.f32.mrf.mxu2 }
 0x1bd   : > { %v869_v37 = vrot.slane %v4229_v32, 7  ;;  %v950_v45 = vrot.slane %v4229_v32, 1 }
 0x1bf   : > { %v870_v13 = vsel %vm834_vm3, %v868_v29, %v869_v37  ;;  %v991_v49 = vsel %vm915_vm4, %v950_v45, 0.0  ;;  %v951_v51 = vsel %vm915_vm4, %v949_v48, %v950_v45  ;;  %v851_v29 = vrot.slane %v4283_v17, 7 }
 0x1c0   : > { %1056 = vrot.lane.b32.xlu0 %v910_v33, %s3728_s30  ;;  %1168 = vrot.lane.b32.xlu1 %v927_v34, %s3730_s20  ;;  %v931_v33 = vrot.slane %v4265_v59, 1 }
 0x1c1   : > { %1024 = vrot.lane.b32.xlu2 %v902_v36, %s3728_s30  ;;  %v985_v36 = vsel %vm915_vm4, %v932_v30, 0.0  ;;  %v852_v14 = vsel %vm834_vm3, %v850_v7, %v851_v29  ;;  %v4324_v45 = vpop.f32.mrf.mxu0 }
 0x1c4   : > { %v4243_v42 = vpop.f32.mrf.mxu2 }
 0x1c5   : > { %v871_v55 = vrot.slane %v4243_v42, 7  ;;  %v952_v15 = vrot.slane %v4243_v42, 1 }
 0x1c7   : > { %v911_v63 = vsel %vm834_vm3, 0.0, %v871_v55 }
 0x1c8   : > { %1058 = vrot.lane.b32.xlu1 %v870_v13, %s3728_s30  ;;  %1026 = vrot.lane.b32.xlu0 %v846_v40, %s3728_s30  ;;  %v933_v13 = vsel %vm915_vm4, %v931_v33, %v932_v30 }
 0x1c9   : > { %1170 = vrot.lane.b32.xlu2 %v983_v43, %s3730_s20 }
 0x1cc   : > { %v4260_v52 = vpop.f32.mrf.mxu2 }
 0x1cd   : > { %v872_v1 = vrot.slane %v4260_v52, 7  ;;  %v953_v2 = vrot.slane %v4260_v52, 1 }
 0x1ce   : > { %v4310_v34 = vpop.permute.xlu1 %1156 }
 0x1cf   : > { %v954_v16 = vsel %vm915_vm4, %v952_v15, %v953_v2  ;;  %v873_v8 = vsel %vm834_vm3, %v871_v55, %v872_v1  ;;  %v992_v25 = vsel %vm915_vm4, %v953_v2, 0.0  ;;  %v853_v2 = vrot.slane %v4303_v27, 7  ;;  %v4340_v15 = vpop.f32.mrf.mxu0 }
 0x1d0   : > { %1202 = vrot.lane.b32.xlu0 %v991_v49, %s3730_s20  ;;  %1028 = vrot.lane.b32.xlu1 %v903_v50, %s3728_s30 }
 0x1d1   : > { %1200 = vrot.lane.b32.xlu2 %v951_v51, %s3730_s20 }
 0x1d4   : > { %v4278_v3 = vpop.f32.mrf.mxu2 }
 0x1d5   : > { %v874_v20 = vrot.slane %v4278_v3, 7  ;;  %v955_v49 = vrot.slane %v4278_v3, 1 }
 0x1d7   : > { %v912_v24 = vsel %vm834_vm3, 0.0, %v874_v20 }
 0x1d8   : > { %1174 = vrot.lane.b32.xlu1 %v984_v60, %s3730_s20  ;;  %1172 = vrot.lane.b32.xlu0 %v930_v61, %s3730_s20  ;;  %v854_v60 = vrot.slane %v4324_v45, 7  ;;  %v935_v61 = vrot.slane %v4324_v45, 1 }
 0x1d9   : > { %1060 = vrot.lane.b32.xlu2 %v911_v63, %s3728_s30 }
 0x1da   : > { %v4305_v28 = vpop.permute.xlu2 %1188 }
 0x1dc   : > { %v4295_v22 = vpop.f32.mrf.mxu2 }
 0x1dd   : > { %v956_v43 = vrot.slane %v4295_v22, 1  ;;  %v875_v48 = vrot.slane %v4295_v22, 7 }
 0x1df   : > { %v957_v55 = vsel %vm915_vm4, %v955_v49, %v956_v43  ;;  %v876_v57 = vsel %vm834_vm3, %v874_v20, %v875_v48  ;;  %v993_v20 = vsel %vm915_vm4, %v956_v43, 0.0 }
 0x1e0   : > { %1204 = vrot.lane.b32.xlu1 %v954_v16, %s3730_s20  ;;  %1062 = vrot.lane.b32.xlu0 %v873_v8, %s3728_s30  ;;  %v936_v16 = vsel %vm915_vm4, %v934_v9, %v935_v61  ;;  %v855_v8 = vsel %vm834_vm3, %v853_v2, %v854_v60 }
 0x1e1   : > { %1030 = vrot.lane.b32.xlu2 %v849_v18, %s3728_s30 }
 0x1e4   : > { %v4314_v37 = vpop.f32.mrf.mxu2 }
 0x1e5   : > { %v877_v44 = vrot.slane %v4314_v37, 7  ;;  %v958_v29 = vrot.slane %v4314_v37, 1 }
 0x1e7   : > { %v913_v54 = vsel %vm834_vm3, 0.0, %v877_v44 }
 0x1e8   : > { %1064 = vrot.lane.b32.xlu1 %v912_v24, %s3728_s30  ;;  %1032 = vrot.lane.b32.xlu0 %v904_v26, %s3728_s30 }
 0x1e9   : > { %1206 = vrot.lane.b32.xlu2 %v992_v25, %s3730_s20 }
 0x1ea   : > { %v1045_v31 = vpop.permute.xlu0 %1044 }
 0x1ec   : > { %v4336_v1 = vpop.f32.mrf.mxu2 }
 0x1ed   : > { %v878_v24 = vrot.slane %v4336_v1, 7  ;;  %v959_v26 = vrot.slane %v4336_v1, 1 }
 0x1ef   : > { %v879_v33 = vsel %vm834_vm3, %v877_v44, %v878_v24 }
 0x1f0   : > { %1178 = vrot.lane.b32.xlu0 %v985_v36, %s3730_s20  ;;  %1034 = vrot.lane.b32.xlu1 %v852_v14, %s3728_s30  ;;  %v960_v36 = vsel %vm915_vm4, %v958_v29, %v959_v26  ;;  %v4355_v14 = vpop.f32.mrf.mxu0 }
 0x1f1   : > { %1176 = vrot.lane.b32.xlu2 %v933_v13, %s3730_s20  ;;  %v905_v13 = vsel %vm834_vm3, 0.0, %v853_v2  ;;  %v938_v49 = vrot.slane %v4355_v14, 1  ;;  %v1124_v2 = vadd.f32 %v1045_v31, %v4136_v35 }
 0x1f2   : > { %v4320_v40 = vpop.permute.xlu2 %1048  ;;  %v1047_v50 = vpop.permute.xlu1 %1046 }
 0x1f3   : > { %v1015_v51 = vpop.permute.xlu0 %1014  ;;  %v1125_v9 = vadd.f32 %v1047_v50, %v4143_v39  ;;  %v856_v39 = vrot.slane %v4340_v15, 7 }
 0x1f4   : > { %v4351_v30 = vpop.f32.mrf.mxu2  ;;  %v1109_v44 = vadd.f32 %v1015_v51, %v4119_v5  ;;  %v1108_v5 = vadd.f32 %v4269_v62, %v4112_v23 }
 0x1f5   : > { %v880_v29 = vrot.slane %v4351_v30, 7 }
 0x1f6   : > { %v1253_v51 = vadd.f32 %v4289_v19, %v1109_v44  ;;  %v906_v19 = vsel %vm834_vm3, 0.0, %v856_v39 }
 0x1f8   : > { %1068 = vrot.lane.b32.xlu0 %v913_v54, %s3728_s30  ;;  %1208 = vrot.lane.b32.xlu1 %v957_v55, %s3730_s20  ;;  %v937_v55 = vrot.slane %v4340_v15, 1 }
 0x1f9   : > { %1066 = vrot.lane.b32.xlu2 %v876_v57, %s3728_s30  ;;  %v994_v57 = vsel %vm915_vm4, %v959_v26, 0.0  ;;  %v1268_v26 = vadd.f32 %v4305_v28, %v1124_v2 }
 0x1fa   : > { %v1017_v7 = vpop.permute.xlu1 %1016  ;;  %v939_v60 = vsel %vm915_vm4, %v937_v55, %v938_v49  ;;  %v1126_v55 = vadd.f32 %v4320_v40, %v4168_v53 }
 0x1fb   : > { %v1019_v63 = vpop.permute.xlu2 %1018  ;;  %v1191_v18 = vpop.permute.xlu0 %1190 }
 0x200   : > { %1180 = vrot.lane.b32.xlu1 %v936_v16, %s3730_s20  ;;  %1038 = vrot.lane.b32.xlu0 %v855_v8, %s3728_s30  ;;  %v4368_v16 = vpop.f32.mrf.mxu2  ;;  %v986_v8 = vsel %vm915_vm4, %v935_v61, 0.0  ;;  %v1252_v61 = vadd.f32 %v4310_v34, %v1108_v5  ;;  %v914_v34 = vsel %vm834_vm3, 0.0, %v880_v29 }
 0x201   : > { %1210 = vrot.lane.b32.xlu2 %v993_v20, %s3730_s20  ;;  %v1269_v20 = vadd.f32 %v1191_v18, %v1125_v9  ;;  %v881_v31 = vrot.slane %v4368_v16, 7  ;;  %v857_v9 = vrot.slane %v4355_v14, 7 }
 0x202   : > { %v1163_v43 = vpop.permute.xlu1 %1162  ;;  %v1290_v28 = vadd.f32 %v4293_v21, %v1252_v61 }
 0x203   : > { %v1195_v25 = vpop.permute.xlu2 %1194  ;;  %v1161_v48 = vpop.permute.xlu0 %1160  ;;  %v1307_v23 = vadd.f32 %v4293_v21, %v1269_v20  ;;  %v882_v18 = vsel %vm834_vm3, %v880_v29, %v881_v31 }
 0x208   : > { %1070 = vrot.lane.b32.xlu1 %v879_v33, %s3728_s30  ;;  %1212 = vrot.lane.b32.xlu0 %v960_v36, %s3730_s20  ;;  %v1291_v33 = vadd.f32 %v4293_v21, %v1253_v51  ;;  %v1306_v36 = vadd.f32 %v4293_v21, %v1268_v26  ;;  %v987_v26 = vsel %vm915_vm4, %v938_v49, 0.0 }
 0x209   : > { %1036 = vrot.lane.b32.xlu2 %v905_v13, %s3728_s30  ;;  %v1111_v13 = vadd.f32 %v1019_v63, %v4157_v47 }
 0x20a   : > { %v1323_v44 = vmax.f32 %v1291_v33, 0.0  ;;  %v1338_v53 = vmax.f32 %v1306_v36, 0.0 }
 0x20b   : > { %v1165_v54 = vpop.permute.xlu2 %1164 }
 0x210   : > { %1214 = vrot.lane.b32.xlu1 %v994_v57, %s3730_s20  ;;  %1184 = vrot.lane.b32.xlu0 %v939_v60, %s3730_s20  ;;  %v1339_v57 = vmax.f32 %v1307_v23, 0.0  ;;  %v1255_v60 = vadd.f32 %v1163_v43, %v1111_v13  ;;  %v1355_v43 = vpack.c.bf16 %v1323_v44, %v1323_v44  ;;  %v961_v44 = vrot.slane %v4351_v30, 1 }
 0x211   : > { %1182 = vrot.lane.b32.xlu2 %v986_v8, %s3730_s20  ;;  %v962_v8 = vrot.slane %v4368_v16, 1 }
 0x212   : > { %v1193_v24 = vpop.permute.xlu1 %1192  ;;  %v1051_v35 = vpop.permute.xlu0 %1050  ;;  %v1293_v31 = vadd.f32 %v4293_v21, %v1255_v60  ;;  %v1419_v36 = vunpack.c.l.b16 %v1355_v43 }
 0x213   : > { %v4379_v50 = vpop.permute.xlu2 %1054  ;;  %v1127_v62 = vadd.f32 %v1051_v35, %v4176_v58  ;;  %v1110_v58 = vadd.f32 %v1017_v7, %v4147_v41  ;;  %v1270_v40 = vadd.f32 %v1193_v24, %v1126_v55  ;;  %v1322_v41 = vmax.f32 %v1290_v28, 0.0 }
 0x214   : > { %v1371_v35 = vpack.c.bf16 %v1339_v57, %v1339_v57  ;;  %v1370_v24 = vpack.c.bf16 %v1338_v53, %v1338_v53 }
 0x215   : > { %v1271_v2 = vadd.f32 %v1195_v25, %v1127_v62  ;;  %v1254_v5 = vadd.f32 %v1161_v48, %v1110_v58  ;;  %v995_v48 = vsel %vm915_vm4, %v962_v8, 0.0  ;;  %v1308_v29 = vadd.f32 %v4293_v21, %v1270_v40 }
 0x216   : > { %v1435_v23 = vunpack.c.l.b16 %v1371_v35  ;;  %v1325_v62 = vmax.f32 %v1293_v31, 0.0  ;;  %v1434_v58 = vunpack.c.l.b16 %v1370_v24 }
 0x217   : > { %v1309_v25 = vadd.f32 %v4293_v21, %v1271_v2  ;;  %v1292_v61 = vadd.f32 %v4293_v21, %v1254_v5  ;;  %v1340_v28 = vmax.f32 %v1308_v29, 0.0 }
 0x218   : > { %1040 = vrot.lane.b32.xlu1 %v906_v19, %s3728_s30  ;;  %1074 = vrot.lane.b32.xlu0 %v882_v18, %s3728_s30  ;;  %v1357_v2 = vpack.c.bf16 %v1325_v62, %v1325_v62 }
 0x219   : > { %1072 = vrot.lane.b32.xlu2 %v914_v34, %s3728_s30  ;;  %v1341_v19 = vmax.f32 %v1309_v25, 0.0  ;;  %v1324_v13 = vmax.f32 %v1292_v61, 0.0  ;;  %v1372_v40 = vpack.c.bf16 %v1340_v28, %v1340_v28 }
 0x21a   : > { %v1053_v47 = vpop.permute.xlu1 %1052  ;;  %v1021_v63 = vpop.permute.xlu0 %1020  ;;  %v1421_v25 = vunpack.c.l.b16 %v1357_v2 }
 0x21b   : > { %v1112_v51 = vadd.f32 %v1021_v63, %v4173_v56  ;;  %v4402_v20 = vpop.permute.xlu2 %1024  ;;  %v858_v56 = vsel %vm834_vm3, %v856_v39, %v857_v9  ;;  %v1458_v9 = vpack.c.b16 %v1435_v23, %v1434_v58  ;;  %v1373_v5 = vpack.c.bf16 %v1341_v19, %v1341_v19 }
 0x21c   : > { %v1114_v28 = vadd.f32 %v4402_v20, %v4204_v12 }
 0x21d   : > { %v1256_v7 = vadd.f32 %v1165_v54, %v1112_v51  ;;  %v1354_v54 = vpack.c.bf16 %v1322_v41, %v1322_v41  ;;  %v1356_v51 = vpack.c.bf16 %v1324_v13, %v1324_v13  ;;  %v1129_v41 = vadd.f32 %v4379_v50, %v4201_v0 }
 0x21f   : > { %v1294_v33 = vadd.f32 %v4293_v21, %v1256_v7  ;;  %v1418_v55 = vunpack.c.l.b16 %v1354_v54  ;;  %v1128_v7 = vadd.f32 %v1053_v47, %v4190_v6 }
 0x220   : > { %1186 = vrot.lane.b32.xlu1 %v987_v26, %s3730_s20  ;;  %1218 = vrot.lane.b32.xlu0 %v995_v48, %s3730_s20  ;;  %v1437_v26 = vunpack.c.l.b16 %v1373_v5  ;;  %v1420_v48 = vunpack.c.l.b16 %v1356_v51 }
 0x221   : > { %1042 = vrot.lane.b32.xlu2 %v858_v56, %s3728_s30  ;;  %v1326_v57 = vmax.f32 %v1294_v33, 0.0  ;;  %v1450_v63 = vpack.c.b16 %v1419_v36, %v1418_v55  ;;  %v1436_v33 = vunpack.c.l.b16 %v1372_v40 }
 0x222   : > { %v1167_v49 = vpop.permute.xlu0 %1166  ;;  %v1023_v18 = vpop.permute.xlu1 %1022  ;;  %v1451_v19 = vpack.c.b16 %v1421_v25, %v1420_v48 }
 0x223   : > { %v1113_v39 = vadd.f32 %v1023_v18, %v4188_v4  ;;  %v4416_v34 = vpop.permute.xlu2 %1170  ;;  %v963_v4 = vsel %vm915_vm4, %v961_v44, %v962_v8  ;;  %v1358_v31 = vpack.c.bf16 %v1326_v57, %v1326_v57  ;;  %v1459_v47 = vpack.c.b16 %v1437_v26, %v1436_v33 }
 0x225   : > { %v1257_v60 = vadd.f32 %v1167_v49, %v1113_v39  ;;  %v1422_v50 = vunpack.c.l.b16 %v1358_v31 }
 0x227   : > { %v1295_v53 = vadd.f32 %v4293_v21, %v1257_v60 }
 0x228   : > { %1466 = vrot.lane.b32.xlu1 %v1450_v63, %s3730_s20  ;;  %1482 = vrot.lane.b32.xlu0 %v1458_v9, %s3730_s20 }
 0x229   : > { %v1327_v35 = vmax.f32 %v1295_v53, 0.0  ;;  %1216 = vrot.lane.b32.xlu2 %v963_v4, %s3730_s20 }
 0x22a   : > { %v1197_v43 = vpop.permute.xlu0 %1196  ;;  %v1199_v61 = vpop.permute.xlu1 %1198 }
 0x22b   : > { %v1272_v56 = vadd.f32 %v1197_v43, %v1128_v7  ;;  %v1273_v29 = vadd.f32 %v1199_v61, %v1129_v41  ;;  %v1201_v54 = vpop.permute.xlu2 %1200  ;;  %v1359_v24 = vpack.c.bf16 %v1327_v35, %v1327_v35 }
 0x22d   : > { %v1310_v8 = vadd.f32 %v4293_v21, %v1272_v56  ;;  %v1311_v0 = vadd.f32 %v4293_v21, %v1273_v29  ;;  %v1423_v6 = vunpack.c.l.b16 %v1359_v24 }
 0x22f   : > { %v1342_v23 = vmax.f32 %v1310_v8, 0.0  ;;  %v1343_v62 = vmax.f32 %v1311_v0, 0.0  ;;  %v1452_v49 = vpack.c.b16 %v1423_v6, %v1422_v50 }
 0x230   : > { %1484 = vrot.lane.b32.xlu1 %v1459_v47, %s3730_s20 }
 0x231   : > { %v1374_v18 = vpack.c.bf16 %v1342_v23, %v1342_v23  ;;  %v1375_v36 = vpack.c.bf16 %v1343_v62, %v1343_v62  ;;  %1468 = vrot.lane.b32.xlu2 %v1451_v19, %s3730_s20  ;;  %1470 = vrot.lane.b32.xlu0 %v1452_v49, %s3730_s20 }
 0x232   : > { %v1057_v13 = vpop.permute.xlu0 %1056  ;;  %v1169_v39 = vpop.permute.xlu1 %1168 }
 0x233   : > { %v1438_v55 = vunpack.c.l.b16 %v1374_v18  ;;  %v1439_v58 = vunpack.c.l.b16 %v1375_v36  ;;  %v1061_v44 = vpop.permute.xlu2 %1060  ;;  %v1258_v57 = vadd.f32 %v1169_v39, %v1114_v28  ;;  %v1130_v2 = vadd.f32 %v1057_v13, %v4214_v10 }
 0x235   : > { %v1460_v60 = vpack.c.b16 %v1439_v58, %v1438_v55  ;;  %v1296_v63 = vadd.f32 %v4293_v21, %v1258_v57  ;;  %v1274_v51 = vadd.f32 %v1201_v54, %v1130_v2 }
 0x237   : > { %v1328_v4 = vmax.f32 %v1296_v63, 0.0  ;;  %v1312_v20 = vadd.f32 %v4293_v21, %v1274_v51 }
 0x239   : > { %1486 = vrot.lane.b32.xlu2 %v1460_v60, %s3730_s20  ;;  %v1360_v7 = vpack.c.bf16 %v1328_v4, %v1328_v4  ;;  %v1344_v43 = vmax.f32 %v1312_v20, 0.0 }
 0x23a   : > { %v1059_v9 = vpop.permute.xlu1 %1058  ;;  %v1027_v5 = vpop.permute.xlu0 %1026 }
 0x23b   : > { %v1115_v53 = vadd.f32 %v1027_v5, %v4219_v11  ;;  %v1031_v40 = vpop.permute.xlu2 %1030  ;;  %v1131_v10 = vadd.f32 %v1059_v9, %v4229_v32  ;;  %v1424_v56 = vunpack.c.l.b16 %v1360_v7  ;;  %v1376_v24 = vpack.c.bf16 %v1344_v43, %v1344_v43 }
 0x23c   : > { %v1117_v33 = vadd.f32 %v1031_v40, %v4251_v46 }
 0x23d   : > { %v1259_v12 = vadd.f32 %v4416_v34, %v1115_v53  ;;  %v1440_v19 = vunpack.c.l.b16 %v1376_v24 }
 0x23f   : > { %v1297_v41 = vadd.f32 %v4293_v21, %v1259_v12 }
 0x241   : > { %v1329_v35 = vmax.f32 %v1297_v41, 0.0 }
 0x242   : > { %v1203_v31 = vpop.permute.xlu0 %1202  ;;  %v1029_v25 = vpop.permute.xlu1 %1028 }
 0x243   : > { %v1275_v61 = vadd.f32 %v1203_v31, %v1131_v10  ;;  %v1207_v26 = vpop.permute.xlu2 %1206  ;;  %v1361_v48 = vpack.c.bf16 %v1329_v35, %v1329_v35  ;;  %v1116_v0 = vadd.f32 %v1029_v25, %v4237_v38  ;;  %v1132_v38 = vadd.f32 %v1061_v44, %v4243_v42 }
 0x245   : > { %v1313_v11 = vadd.f32 %v4293_v21, %v1275_v61  ;;  %v1425_v29 = vunpack.c.l.b16 %v1361_v48 }
 0x247   : > { %v1345_v54 = vmax.f32 %v1313_v11, 0.0  ;;  %v1453_v34 = vpack.c.b16 %v1425_v29, %v1424_v56 }
 0x249   : > { %v1377_v8 = vpack.c.bf16 %v1345_v54, %v1345_v54  ;;  %1472 = vrot.lane.b32.xlu1 %v1453_v34, %s3730_s20 }
 0x24a   : > { %v1175_v32 = vpop.permute.xlu1 %1174  ;;  %v1173_v50 = vpop.permute.xlu0 %1172 }
 0x24b   : > { %v1441_v6 = vunpack.c.l.b16 %v1377_v8  ;;  %v1261_v47 = vadd.f32 %v1175_v32, %v1117_v33  ;;  %v1260_v23 = vadd.f32 %v1173_v50, %v1116_v0  ;;  %v1177_v62 = vpop.permute.xlu2 %1176 }
 0x24d   : > { %v1299_v49 = vadd.f32 %v4293_v21, %v1261_v47  ;;  %v1298_v18 = vadd.f32 %v4293_v21, %v1260_v23  ;;  %v1461_v36 = vpack.c.b16 %v1441_v6, %v1440_v19 }
 0x24f   : > { %v1331_v13 = vmax.f32 %v1299_v49, 0.0  ;;  %v1330_v39 = vmax.f32 %v1298_v18, 0.0  ;;  %1488 = vrot.lane.b32.xlu0 %v1461_v36, %s3730_s20 }
 0x251   : > { %v1363_v46 = vpack.c.bf16 %v1331_v13, %v1331_v13  ;;  %v1362_v28 = vpack.c.bf16 %v1330_v39, %v1330_v39 }
 0x252   : > { %v1205_v55 = vpop.permute.xlu1 %1204  ;;  %v1063_v58 = vpop.permute.xlu0 %1062 }
 0x253   : > { %v1427_v57 = vunpack.c.l.b16 %v1363_v46  ;;  %v1426_v60 = vunpack.c.l.b16 %v1362_v28  ;;  %v1276_v2 = vadd.f32 %v1205_v55, %v1132_v38  ;;  %v1133_v63 = vadd.f32 %v1063_v58, %v4260_v52  ;;  %v1067_v9 = vpop.permute.xlu2 %1066 }
 0x254   : > { %v1135_v43 = vadd.f32 %v1067_v9, %v4295_v22 }
 0x255   : > { %v1314_v5 = vadd.f32 %v4293_v21, %v1276_v2  ;;  %v1277_v51 = vadd.f32 %v1207_v26, %v1133_v63  ;;  %v1454_v53 = vpack.c.b16 %v1427_v57, %v1426_v60 }
 0x257   : > { %v1346_v40 = vmax.f32 %v1314_v5, 0.0  ;;  %v1315_v4 = vadd.f32 %v4293_v21, %v1277_v51  ;;  %1474 = vrot.lane.b32.xlu2 %v1454_v53, %s3730_s20 }
 0x259   : > { %v1378_v42 = vpack.c.bf16 %v1346_v40, %v1346_v40  ;;  %v1347_v44 = vmax.f32 %v1315_v4, 0.0 }
 0x25a   : > { %v1065_v12 = vpop.permute.xlu1 %1064  ;;  %v1033_v20 = vpop.permute.xlu0 %1032 }
 0x25b   : > { %v1118_v41 = vadd.f32 %v1033_v20, %v4265_v59  ;;  %v1211_v7 = vpop.permute.xlu2 %1210  ;;  %v1379_v10 = vpack.c.bf16 %v1347_v44, %v1347_v44  ;;  %v1442_v35 = vunpack.c.l.b16 %v1378_v42  ;;  %v1134_v33 = vadd.f32 %v1065_v12, %v4278_v3 }
 0x25c   : > { %v1279_v56 = vadd.f32 %v1211_v7, %v1135_v43 }
 0x25d   : > { %v1262_v52 = vadd.f32 %v1177_v62, %v1118_v41  ;;  %v1443_v31 = vunpack.c.l.b16 %v1379_v10 }
 0x25e   : > { %v1317_v34 = vadd.f32 %v4293_v21, %v1279_v56 }
 0x25f   : > { %v1462_v25 = vpack.c.b16 %v1443_v31, %v1442_v35  ;;  %v1300_v61 = vadd.f32 %v4293_v21, %v1262_v52 }
 0x260   : > { %v1349_v50 = vmax.f32 %v1317_v34, 0.0 }
 0x261   : > { %1490 = vrot.lane.b32.xlu1 %v1462_v25, %s3730_s20  ;;  %v1332_v54 = vmax.f32 %v1300_v61, 0.0 }
 0x262   : > { %v1179_v26 = vpop.permute.xlu0 %1178  ;;  %v1035_v48 = vpop.permute.xlu1 %1034  ;;  %v1381_v49 = vpack.c.bf16 %v1349_v50, %v1349_v50 }
 0x263   : > { %v1119_v11 = vadd.f32 %v1035_v48, %v4283_v17  ;;  %v1037_v29 = vpop.permute.xlu2 %1036  ;;  %v1364_v22 = vpack.c.bf16 %v1332_v54, %v1332_v54 }
 0x264   : > { %v1120_v13 = vadd.f32 %v1037_v29, %v4303_v27  ;;  %v1445_v46 = vunpack.c.l.b16 %v1381_v49 }
 0x265   : > { %v1263_v59 = vadd.f32 %v1179_v26, %v1119_v11  ;;  %v1428_v17 = vunpack.c.l.b16 %v1364_v22 }
 0x267   : > { %v1301_v24 = vadd.f32 %v4293_v21, %v1263_v59 }
 0x269   : > { %v1333_v8 = vmax.f32 %v1301_v24, 0.0 }
 0x26a   : > { %v1069_v0 = vpop.permute.xlu0 %1068  ;;  %v1209_v32 = vpop.permute.xlu1 %1208 }
 0x26b   : > { %v1278_v6 = vadd.f32 %v1209_v32, %v1134_v33  ;;  %v1183_v47 = vpop.permute.xlu2 %1182  ;;  %v1365_v23 = vpack.c.bf16 %v1333_v8, %v1333_v8  ;;  %v1136_v27 = vadd.f32 %v1069_v0, %v4314_v37 }
 0x26d   : > { %v1316_v62 = vadd.f32 %v4293_v21, %v1278_v6  ;;  %v1429_v19 = vunpack.c.l.b16 %v1365_v23 }
 0x26f   : > { %v1348_v18 = vmax.f32 %v1316_v62, 0.0  ;;  %v1455_v36 = vpack.c.b16 %v1429_v19, %v1428_v17 }
 0x271   : > { %v1380_v39 = vpack.c.bf16 %v1348_v18, %v1348_v18  ;;  %1476 = vrot.lane.b32.xlu0 %v1455_v36, %s3730_s20 }
 0x272   : > { %v1181_v3 = vpop.permute.xlu1 %1180  ;;  %v1039_v38 = vpop.permute.xlu0 %1038 }
 0x273   : > { %v1444_v28 = vunpack.c.l.b16 %v1380_v39  ;;  %v1264_v55 = vadd.f32 %v1181_v3, %v1120_v13  ;;  %v1121_v58 = vadd.f32 %v1039_v38, %v4324_v45  ;;  %v1073_v57 = vpop.permute.xlu2 %1072 }
 0x274   : > { %v1138_v48 = vadd.f32 %v1073_v57, %v4351_v30 }
 0x275   : > { %v1302_v60 = vadd.f32 %v4293_v21, %v1264_v55  ;;  %v1265_v2 = vadd.f32 %v1183_v47, %v1121_v58  ;;  %v1463_v63 = vpack.c.b16 %v1445_v46, %v1444_v28 }
 0x277   : > { %v1334_v9 = vmax.f32 %v1302_v60, 0.0  ;;  %v1303_v5 = vadd.f32 %v4293_v21, %v1265_v2  ;;  %1492 = vrot.lane.b32.xlu2 %v1463_v63, %s3730_s20  ;;  %v3731_v60 = vmov 0  }
 0x279   : > { %v1366_v51 = vpack.c.bf16 %v1334_v9, %v1334_v9  ;;  %v1335_v53 = vmax.f32 %v1303_v5, 0.0 }
 0x27a   : > { %v1071_v40 = vpop.permute.xlu1 %1070  ;;  %v1213_v4 = vpop.permute.xlu0 %1212 }
 0x27b   : > { %v1280_v42 = vadd.f32 %v1213_v4, %v1136_v27  ;;  %v1367_v44 = vpack.c.bf16 %v1335_v53, %v1335_v53  ;;  %v1430_v12 = vunpack.c.l.b16 %v1366_v51  ;;  %v1043_v20 = vpop.permute.xlu2 %1042  ;;  %v1137_v10 = vadd.f32 %v1071_v40, %v4336_v1  ;;  %v3380_v53 = vld [vmem:[#allocation7 + $0x28] sm:$0xff]  ;;  %v3379_v4 = vld [vmem:[#allocation7 + $0x20] sm:$0xff] }
 0x27c   : > { %v1123_v0 = vadd.f32 %v1043_v20, %v4355_v14  ;;  %1725 = vmatpush.bf16.msra.mxu1 %v3380_v53  ;;  %3388 = vmatpush.bf16.msra.mxu3 %v3380_v53  ;;  %v3375_v20 = vld [vmem:[#allocation7] sm:$0xff] }
 0x27d   : > { %v1431_v45 = vunpack.c.l.b16 %v1367_v44  ;;  %v1318_v41 = vadd.f32 %v4293_v21, %v1280_v42  ;;  %v3378_v42 = vld [vmem:[#allocation7 + $0x18] sm:$0xff] }
 0x27f   : > { %v1456_v7 = vpack.c.b16 %v1431_v45, %v1430_v12  ;;  %v1350_v31 = vmax.f32 %v1318_v41, 0.0  ;;  %v3377_v12 = vld [vmem:[#allocation7 + $0x10] sm:$0xff]  ;;  %v3376_v45 = vld [vmem:[#allocation7 + $0x8] sm:$0xff] }
 0x280   : > { %1726 = vmatpush.bf16.msra.mxu1 %v3379_v4  ;;  %3389 = vmatpush.bf16.msra.mxu3 %v3379_v4 }
 0x281   : > { %1478 = vrot.lane.b32.xlu1 %v1456_v7, %s3730_s20  ;;  %v1382_v43 = vpack.c.bf16 %v1350_v31, %v1350_v31 }
 0x282   : > { %v1215_v35 = vpop.permute.xlu1 %1214  ;;  %v1185_v52 = vpop.permute.xlu0 %1184 }
 0x283   : > { %v1281_v37 = vadd.f32 %v1215_v35, %v1137_v10  ;;  %v1217_v26 = vpop.permute.xlu2 %1216  ;;  %v1446_v54 = vunpack.c.l.b16 %v1382_v43 }
 0x284   : > { %v1282_v34 = vadd.f32 %v1217_v26, %v1138_v48  ;;  %1727 = vmatpush.bf16.msra.mxu1 %v3378_v42  ;;  %3390 = vmatpush.bf16.msra.mxu3 %v3378_v42 }
 0x285   : > { %v1319_v25 = vadd.f32 %v4293_v21, %v1281_v37 }
 0x286   : > { %v1320_v8 = vadd.f32 %v4293_v21, %v1282_v34 }
 0x287   : > { %v1351_v61 = vmax.f32 %v1319_v25, 0.0 }
 0x288   : > { %v1352_v6 = vmax.f32 %v1320_v8, 0.0  ;;  %1728 = vmatpush.bf16.msra.mxu1 %v3377_v12  ;;  %3391 = vmatpush.bf16.msra.mxu3 %v3377_v12 }
 0x289   : > { %v1383_v56 = vpack.c.bf16 %v1351_v61, %v1351_v61 }
 0x28a   : > { %v1041_v11 = vpop.permute.xlu1 %1040  ;;  %v1075_v29 = vpop.permute.xlu0 %1074  ;;  %v1384_v49 = vpack.c.bf16 %v1352_v6, %v1352_v6 }
 0x28b   : > { %v1447_v59 = vunpack.c.l.b16 %v1383_v56  ;;  %v1122_v1 = vadd.f32 %v1041_v11, %v4340_v15  ;;  %v1139_v30 = vadd.f32 %v1075_v29, %v4368_v16  ;;  %v4483_v19 = vpop.permute.xlu2 %1468 }
 0x28c   : > { %v1448_v3 = vunpack.c.l.b16 %v1384_v49  ;;  %1729 = vmatpush.bf16.msra.mxu1 %v3376_v45  ;;  %3392 = vmatpush.bf16.msra.mxu3 %v3376_v45 }
 0x28d   : > { %v1266_v24 = vadd.f32 %v1185_v52, %v1122_v1  ;;  %v1464_v33 = vpack.c.b16 %v1447_v59, %v1446_v54 }
 0x28f   : > { %v1304_v22 = vadd.f32 %v4293_v21, %v1266_v24  ;;  %1494 = vrot.lane.b32.xlu0 %v1464_v33, %s3730_s20 }
 0x290   : > { %1730 = vmatpush.bf16.msra.mxu1 %v3375_v20  ;;  %3393 = vmatpush.bf16.msra.mxu3 %v3375_v20 }
 0x291   : > { %v1336_v47 = vmax.f32 %v1304_v22, 0.0 }
 0x292   : > { %v1187_v32 = vpop.permute.xlu1 %1186  ;;  %v1219_v50 = vpop.permute.xlu0 %1218 }
 0x293   : > { %v1267_v23 = vadd.f32 %v1187_v32, %v1123_v0  ;;  %v1283_v62 = vadd.f32 %v1219_v50, %v1139_v30  ;;  %v1368_v14 = vpack.c.bf16 %v1336_v47, %v1336_v47  ;;  %v4508_v63 = vpop.permute.xlu2 %1486 }
 0x295   : > { %v1305_v15 = vadd.f32 %v4293_v21, %v1267_v23  ;;  %v1321_v17 = vadd.f32 %v4293_v21, %v1283_v62  ;;  %v1432_v28 = vunpack.c.l.b16 %v1368_v14 }
 0x297   : > { %v1337_v18 = vmax.f32 %v1305_v15, 0.0  ;;  %v1353_v36 = vmax.f32 %v1321_v17, 0.0  ;;  %1512 = vrot.lane.b32.xlu0 %v4483_v19, %s3728_s30 }
 0x299   : > { %v1369_v16 = vpack.c.bf16 %v1337_v18, %v1337_v18  ;;  %v1385_v13 = vpack.c.bf16 %v1353_v36, %v1353_v36 }
 0x29a   : > { %v4487_v39 = vpop.permute.xlu1 %1466  ;;  %v4495_v57 = vpop.permute.xlu0 %1482 }
 0x29b   : > { %v1433_v38 = vunpack.c.l.b16 %v1369_v16  ;;  %v1449_v46 = vunpack.c.l.b16 %v1385_v13 }
 0x29d   : > { %v1457_v55 = vpack.c.b16 %v1433_v38, %v1432_v28  ;;  %v1465_v58 = vpack.c.b16 %v1449_v46, %v1448_v3 }
 0x29f   : > { %1480 = vrot.lane.b32.xlu2 %v1457_v55, %s3730_s20  ;;  %1496 = vrot.lane.b32.xlu1 %v1465_v58, %s3730_s20 }
 0x2a2   : > { %v4491_v21 = vpop.permute.xlu1 %1484 }
 0x2a3   : > { %1559 = vrot.lane.b32.xlu0 %v4491_v21, %s3729_s27  ;;  %v4502_v2 = vpop.permute.xlu0 %1470 }
 0x2a7   : > { %1510 = vrot.lane.b32.xlu2 %v4487_v39, %s3728_s30  ;;  %1528 = vrot.lane.b32.xlu1 %v4491_v21, %s3728_s30 }
 0x2ab   : > { %1573 = vrot.lane.b32.xlu0 %v3731_v60, %s3729_s27 }
 0x2af   : > { %1526 = vrot.lane.b32.xlu2 %v4495_v57, %s3728_s30  ;;  %1514 = vrot.lane.b32.xlu1 %v4502_v2, %s3728_s30 }
 0x2b1   : > { %v4526_v27 = vpop.permute.xlu2 %1474 }
 0x2b3   : > { %1530 = vrot.lane.b32.xlu0 %v4508_v63, %s3728_s30 }
 0x2b7   : > { %1545 = vrot.lane.b32.xlu1 %v4502_v2, %s3729_s27  ;;  %1543 = vrot.lane.b32.xlu2 %v4483_v19, %s3729_s27 }
 0x2bb   : > { %v4516_v9 = vpop.permute.xlu1 %1472 }
 0x2bc   : > { %1547 = vrot.lane.b32.xlu0 %v4516_v9, %s3729_s27 }
 0x2bf   : > { %1561 = vrot.lane.b32.xlu2 %v4508_v63, %s3729_s27 }
 0x2c1   : > { %v4522_v5 = vpop.permute.xlu0 %1488 }
 0x2c2   : > { %1563 = vrot.lane.b32.xlu1 %v4522_v5, %s3729_s27 }
 0x2c4   : > { %1518 = vrot.lane.b32.xlu0 %v4526_v27, %s3728_s30 }
 0x2c7   : > { %1557 = vrot.lane.b32.xlu2 %v4495_v57, %s3729_s27 }
 0x2cc   : > { %1549 = vrot.lane.b32.xlu0 %v4526_v27, %s3729_s27 }
 0x2cf   : > { %1516 = vrot.lane.b32.xlu2 %v4516_v9, %s3728_s30 }
 0x2d1   : > { %v4544_v40 = vpop.permute.xlu2 %1492 }
 0x2d3   : > { %v4536_v51 = vpop.permute.xlu1 %1490 }
 0x2d4   : > { %1565 = vrot.lane.b32.xlu1 %v4536_v51, %s3729_s27  ;;  %1534 = vrot.lane.b32.xlu0 %v4536_v51, %s3728_s30 }
 0x2d7   : > { %1532 = vrot.lane.b32.xlu2 %v4522_v5, %s3728_s30 }
 0x2dc   : > { %1567 = vrot.lane.b32.xlu0 %v4544_v40, %s3729_s27 }
 0x2e3   : > { %v4548_v44 = vpop.permute.xlu0 %1476 }
 0x2e4   : > { %1520 = vrot.lane.b32.xlu1 %v4548_v44, %s3728_s30  ;;  %1551 = vrot.lane.b32.xlu2 %v4548_v44, %s3729_s27 }
 0x2ec   : > { %1536 = vrot.lane.b32.xlu2 %v4544_v40, %s3728_s30 }
 0x2f3   : > { %v4556_v41 = vpop.permute.xlu1 %1478 }
 0x2f4   : > { %1522 = vrot.lane.b32.xlu1 %v4556_v41, %s3728_s30  ;;  %1553 = vrot.lane.b32.xlu0 %v4556_v41, %s3729_s27 }
 0x2f9   : > { %v1481_v7 = vpop.permute.xlu2 %1480 }
 0x2fc   : > { %1524 = vrot.lane.b32.xlu0 %v1481_v7, %s3728_s30 }
 0x301   : > { %v4563_v10 = vpop.permute.xlu0 %1494  ;;  %v1511_v35 = vpop.permute.xlu2 %1510 }
 0x302   : > { %1538 = vrot.lane.b32.xlu1 %v4563_v10, %s3728_s30  ;;  %v1577_v37 = vsel %vm562_vm1, 0, %v1511_v35 }
 0x309   : > { %v1527_v52 = vpop.permute.xlu2 %1526  ;;  %v1513_v31 = vpop.permute.xlu0 %1512 }
 0x30a   : > { %1569 = vrot.lane.b32.xlu1 %v4563_v10, %s3729_s27  ;;  %v1601_v26 = vsel %vm562_vm1, %v1481_v7, %v1527_v52  ;;  %v1580_v33 = vsel %vm562_vm1, %v4487_v39, %v1513_v31 }
 0x311   : > { %v1497_v25 = vpop.permute.xlu1 %1496  ;;  %v1544_v43 = vpop.permute.xlu2 %1543 }
 0x312   : > { %1540 = vrot.lane.b32.xlu2 %v1497_v25, %s3728_s30  ;;  %1555 = vrot.lane.b32.xlu1 %v1481_v7, %s3729_s27  ;;  %v1624_v61 = vsel %vm611_vm0, %v1577_v37, %v1544_v43 }
 0x313   : > { %3329 = vmatmul.msk.bf16.vlgmr.msra.gmra.mxu1 %vm680_vm2, %v1624_v61 }
 0x315   : > { %v1560_v48 = vpop.permute.xlu0 %1559 }
 0x316   : > { %v1640_v56 = vsel %vm611_vm0, %v1601_v26, %v1560_v48 }
 0x317   : > { %3337 = vmatmul.msk.bf16.vlgmr.msra.gmra.mxu3 %vm680_vm2, %v1640_v56 }
 0x319   : > { %v1529_v11 = vpop.permute.xlu1 %1528  ;;  %v1562_v34 = vpop.permute.xlu2 %1561 }
 0x31a   : > { %1571 = vrot.lane.b32.xlu2 %v1497_v25, %s3729_s27  ;;  %v1604_v59 = vsel %vm562_vm1, %v4495_v57, %v1529_v11 }
 0x31b   : > { %v1642_v24 = vsel %vm611_vm0, %v1604_v59, %v1562_v34 }
 0x31d   : > { %v4578_v29 = vpop.permute.xlu0 %1573 }
 0x321   : > { %v1515_v54 = vpop.permute.xlu1 %1514  ;;  %v1558_v30 = vpop.permute.xlu2 %1557 }
 0x322   : > { %v1583_v23 = vsel %vm562_vm1, %v4483_v19, %v1515_v54 }
 0x325   : > { %v1531_v1 = vpop.permute.xlu0 %1530 }
 0x326   : > { %v1607_v32 = vsel %vm562_vm1, %v4491_v21, %v1531_v1 }
 0x327   : > { %3338 = vmatmul.msk.bf16.gmra.mxu3 %vm680_vm2, %v1642_v24 }
 0x329   : > { %v1546_v8 = vpop.permute.xlu1 %1545  ;;  %v1517_v62 = vpop.permute.xlu2 %1516 }
 0x32a   : > { %v1626_v22 = vsel %vm611_vm0, %v1580_v33, %v1546_v8  ;;  %v1586_v16 = vsel %vm562_vm1, %v4502_v2, %v1517_v62 }
 0x32b   : > { %3330 = vmatmul.msk.bf16.gmra.mxu1 %vm680_vm2, %v1626_v22 }
 0x32e   : > { %v1548_v0 = vpop.permute.xlu0 %1547 }
 0x32f   : > { %v1628_v15 = vsel %vm611_vm0, %v1583_v23, %v1548_v0 }
 0x331   : > { %v1533_v49 = vpop.permute.xlu2 %1532 }
 0x332   : > { %v1610_v18 = vsel %vm562_vm1, %v4508_v63, %v1533_v49 }
 0x334   : > { %v1564_v50 = vpop.permute.xlu1 %1563 }
 0x335   : > { %v1644_v6 = vsel %vm611_vm0, %v1607_v32, %v1564_v50 }
 0x336   : > { %v1519_v47 = vpop.permute.xlu0 %1518 }
 0x337   : > { %3339 = vmatmul.msk.bf16.gmra.mxu3 %vm680_vm2, %v1644_v6  ;;  %v1589_v28 = vsel %vm562_vm1, %v4516_v9, %v1519_v47 }
 0x33b   : > { %3331 = vmatmul.msk.bf16.gmra.mxu1 %vm680_vm2, %v1628_v15 }
 0x33e   : > { %v1550_v17 = vpop.permute.xlu0 %1549  ;;  %v1552_v38 = vpop.permute.xlu2 %1551 }
 0x33f   : > { %v1630_v19 = vsel %vm611_vm0, %v1586_v16, %v1550_v17  ;;  %v1632_v55 = vsel %vm611_vm0, %v1589_v28, %v1552_v38 }
 0x346   : > { %v1566_v36 = vpop.permute.xlu1 %1565  ;;  %v1535_v13 = vpop.permute.xlu0 %1534 }
 0x347   : > { %v1646_v14 = vsel %vm611_vm0, %v1610_v18, %v1566_v36  ;;  %v1613_v3 = vsel %vm562_vm1, %v4522_v5, %v1535_v13  ;;  %v1537_v5 = vpop.permute.xlu2 %1536 }
 0x348   : > { %3340 = vmatmul.msk.bf16.gmra.mxu3 %vm680_vm2, %v1646_v14  ;;  %v1616_v53 = vsel %vm562_vm1, %v4536_v51, %v1537_v5 }
 0x34b   : > { %3332 = vmatmul.msk.bf16.gmra.mxu1 %vm680_vm2, %v1630_v19 }
 0x34e   : > { %v1568_v39 = vpop.permute.xlu0 %1567 }
 0x34f   : > { %v1648_v46 = vsel %vm611_vm0, %v1613_v3, %v1568_v39 }
 0x356   : > { %v1521_v58 = vpop.permute.xlu1 %1520 }
 0x357   : > { %v1592_v57 = vsel %vm562_vm1, %v4526_v27, %v1521_v58 }
 0x358   : > { %3341 = vmatmul.msk.bf16.gmra.mxu3 %vm680_vm2, %v1648_v46 }
 0x35b   : > { %3333 = vmatmul.msk.bf16.gmra.mxu1 %vm680_vm2, %v1632_v55 }
 0x366   : > { %v1554_v21 = vpop.permute.xlu0 %1553  ;;  %v1523_v2 = vpop.permute.xlu1 %1522 }
 0x367   : > { %v1634_v60 = vsel %vm611_vm0, %v1592_v57, %v1554_v21  ;;  %v1595_v12 = vsel %vm562_vm1, %v4548_v44, %v1523_v2 }
 0x36b   : > { %3334 = vmatmul.msk.bf16.gmra.mxu1 %vm680_vm2, %v1634_v60 }
 0x36c   : > { %v1541_v42 = vpop.permute.xlu2 %1540 }
 0x36d   : > { %v1622_v48 = vsel %vm562_vm1, %v4563_v10, %v1541_v42 }
 0x36e   : > { %v1525_v35 = vpop.permute.xlu0 %1524  ;;  %v1654_v59 = vsel %vm611_vm0, %v1622_v48, %v4578_v29 }
 0x36f   : > { %v1598_v44 = vsel %vm562_vm1, %v4556_v41, %v1525_v35 }
 0x370   : > { %v1638_v25 = vsel %vm611_vm0, %v1598_v44, %v1558_v30 }
 0x374   : > { %v1539_v63 = vpop.permute.xlu1 %1538  ;;  %v1572_v7 = vpop.permute.xlu2 %1571 }
 0x375   : > { %v1619_v20 = vsel %vm562_vm1, %v4544_v40, %v1539_v63 }
 0x376   : > { %v1652_v51 = vsel %vm611_vm0, %v1619_v20, %v1572_v7 }
 0x37c   : > { %v1570_v9 = vpop.permute.xlu1 %1569 }
 0x37d   : > { %v1650_v4 = vsel %vm611_vm0, %v1616_v53, %v1570_v9 }
 0x37e   : > { %3342 = vmatmul.msk.bf16.gmra.mxu3 %vm680_vm2, %v1650_v4 }
 0x384   : > { %v1556_v27 = vpop.permute.xlu1 %1555 }
 0x385   : > { %v1636_v45 = vsel %vm611_vm0, %v1595_v12, %v1556_v27 }
 0x386   : > { %3335 = vmatmul.msk.bf16.gmra.mxu1 %vm680_vm2, %v1636_v45 }
 0x38e   : > { %3343 = vmatmul.msk.bf16.gmra.mxu3 %vm680_vm2, %v1652_v51 }
 0x390   : > { %v4628_v52 = vpop.f32.mrf.mxu1 }
 0x391   : > { %v1844_v31 = vrot.slane %v4628_v52, 7  ;;  %v1924_v43 = vrot.slane %v4628_v52, 1 }
 0x393   : > { %v1908_v37 = vsel %vm834_vm3, 0.0, %v1844_v31 }
 0x394   : > { %2020 = vrot.lane.b32.xlu1 %v1908_v37, %s3728_s30 }
 0x396   : > { %3336 = vmatmul.msk.bf16.gmra.mxu1 %vm680_vm2, %v1638_v25 }
 0x398   : > { %v4637_v40 = vpop.f32.mrf.mxu1 }
 0x399   : > { %v1845_v61 = vrot.slane %v4637_v40, 7  ;;  %v1925_v26 = vrot.slane %v4637_v40, 1 }
 0x39a   : > { %v4644_v41 = vpop.f32.mrf.mxu3 }
 0x39b   : > { %v1988_v56 = vsel %vm915_vm4, %v1925_v26, 0.0  ;;  %v1926_v11 = vsel %vm915_vm4, %v1924_v43, %v1925_v26  ;;  %v1846_v54 = vsel %vm834_vm3, %v1844_v31, %v1845_v61  ;;  %v1868_v10 = vrot.slane %v4644_v41, 7 }
 0x39c   : > { %2166 = vrot.lane.b32.xlu1 %v1988_v56, %s3730_s20  ;;  %2164 = vrot.lane.b32.xlu0 %v1926_v11, %s3730_s20  ;;  %v1948_v1 = vrot.slane %v4644_v41, 1 }
 0x39d   : > { %2022 = vrot.lane.b32.xlu2 %v1846_v54, %s3728_s30  ;;  %v1916_v33 = vsel %vm834_vm3, 0.0, %v1868_v10 }
 0x39e   : > { %3344 = vmatmul.msk.bf16.gmra.mxu3 %vm680_vm2, %v1654_v59 }
 0x3a2   : > { %v4656_v34 = vpop.f32.mrf.mxu3 }
 0x3a3   : > { %v1949_v24 = vrot.slane %v4656_v34, 1  ;;  %v1869_v32 = vrot.slane %v4656_v34, 7 }
 0x3a5   : > { %2052 = vrot.lane.b32.xlu2 %v1916_v33, %s3728_s30  ;;  %v1950_v8 = vsel %vm915_vm4, %v1948_v1, %v1949_v24  ;;  %v1996_v30 = vsel %vm915_vm4, %v1949_v24, 0.0  ;;  %v1870_v15 = vsel %vm834_vm3, %v1868_v10, %v1869_v32 }
 0x3a6   : > { %2196 = vrot.lane.b32.xlu1 %v1950_v8, %s3730_s20 }
 0x3a8   : > { %v4664_v22 = vpop.f32.mrf.mxu1 }
 0x3a9   : > { %v1847_v29 = vrot.slane %v4664_v22, 7  ;;  %v1927_v47 = vrot.slane %v4664_v22, 1 }
 0x3aa   : > { %v4672_v50 = vpop.f32.mrf.mxu3 }
 0x3ab   : > { %v1909_v0 = vsel %vm834_vm3, 0.0, %v1847_v29  ;;  %v1871_v18 = vrot.slane %v4672_v50, 7  ;;  %v1951_v46 = vrot.slane %v4672_v50, 1 }
 0x3ac   : > { %2024 = vrot.lane.b32.xlu0 %v1909_v0, %s3728_s30 }
 0x3ad   : > { %2198 = vrot.lane.b32.xlu2 %v1996_v30, %s3730_s20  ;;  %v1917_v39 = vsel %vm834_vm3, 0.0, %v1871_v18 }
 0x3b0   : > { %v4674_v6 = vpop.f32.mrf.mxu1 }
 0x3b1   : > { %v1848_v23 = vrot.slane %v4674_v6, 7  ;;  %v1928_v62 = vrot.slane %v4674_v6, 1 }
 0x3b2   : > { %v4688_v14 = vpop.f32.mrf.mxu3 }
 0x3b3   : > { %v1929_v17 = vsel %vm915_vm4, %v1927_v47, %v1928_v62  ;;  %v1849_v49 = vsel %vm834_vm3, %v1847_v29, %v1848_v23  ;;  %v1989_v13 = vsel %vm915_vm4, %v1928_v62, 0.0  ;;  %v1952_v3 = vrot.slane %v4688_v14, 1 }
 0x3b4   : > { %2054 = vrot.lane.b32.xlu0 %v1870_v15, %s3728_s30  ;;  %2026 = vrot.lane.b32.xlu1 %v1849_v49, %s3728_s30  ;;  %v1872_v38 = vrot.slane %v4688_v14, 7 }
 0x3b5   : > { %2168 = vrot.lane.b32.xlu2 %v1929_v17, %s3730_s20  ;;  %v1997_v58 = vsel %vm915_vm4, %v1952_v3, 0.0  ;;  %v1953_v21 = vsel %vm915_vm4, %v1951_v46, %v1952_v3 }
 0x3b6   : > { %v1873_v57 = vsel %vm834_vm3, %v1871_v18, %v1872_v38 }
 0x3b8   : > { %v4686_v36 = vpop.f32.mrf.mxu1 }
 0x3b9   : > { %v1850_v16 = vrot.slane %v4686_v36, 7  ;;  %v1930_v63 = vrot.slane %v4686_v36, 1 }
 0x3ba   : > { %v4702_v55 = vpop.f32.mrf.mxu3 }
 0x3bb   : > { %v1910_v19 = vsel %vm834_vm3, 0.0, %v1850_v16  ;;  %v1874_v12 = vrot.slane %v4702_v55, 7  ;;  %v1954_v20 = vrot.slane %v4702_v55, 1 }
 0x3bc   : > { %2170 = vrot.lane.b32.xlu0 %v1989_v13, %s3730_s20  ;;  %2056 = vrot.lane.b32.xlu1 %v1917_v39, %s3728_s30 }
 0x3bd   : > { %2028 = vrot.lane.b32.xlu2 %v1910_v19, %s3728_s30  ;;  %v1918_v7 = vsel %vm834_vm3, 0.0, %v1874_v12 }
 0x3c0   : > { %v4700_v28 = vpop.f32.mrf.mxu1 }
 0x3c1   : > { %v1851_v60 = vrot.slane %v4700_v28, 7  ;;  %v1931_v2 = vrot.slane %v4700_v28, 1 }
 0x3c2   : > { %v4720_v42 = vpop.f32.mrf.mxu3 }
 0x3c3   : > { %v1932_v53 = vsel %vm915_vm4, %v1930_v63, %v1931_v2  ;;  %v1852_v9 = vsel %vm834_vm3, %v1850_v16, %v1851_v60  ;;  %v1990_v4 = vsel %vm915_vm4, %v1931_v2, 0.0  ;;  %v1955_v45 = vrot.slane %v4720_v42, 1 }
 0x3c4   : > { %2202 = vrot.lane.b32.xlu1 %v1997_v58, %s3730_s20  ;;  %2200 = vrot.lane.b32.xlu0 %v1953_v21, %s3730_s20  ;;  %v1875_v44 = vrot.slane %v4720_v42, 7 }
 0x3c5   : > { %2058 = vrot.lane.b32.xlu2 %v1873_v57, %s3728_s30  ;;  %v1956_v35 = vsel %vm915_vm4, %v1954_v20, %v1955_v45  ;;  %v1998_v43 = vsel %vm915_vm4, %v1955_v45, 0.0 }
 0x3c6   : > { %v1876_v61 = vsel %vm834_vm3, %v1874_v12, %v1875_v44 }
 0x3c8   : > { %v4713_v5 = vpop.f32.mrf.mxu1 }
 0x3c9   : > { %v1853_v27 = vrot.slane %v4713_v5, 7  ;;  %v1933_v11 = vrot.slane %v4713_v5, 1 }
 0x3cb   : > { %v1911_v51 = vsel %vm834_vm3, 0.0, %v1853_v27  ;;  %v4737_v25 = vpop.f32.mrf.mxu3 }
 0x3cc   : > { %2172 = vrot.lane.b32.xlu1 %v1932_v53, %s3730_s20  ;;  %2030 = vrot.lane.b32.xlu0 %v1852_v9, %s3728_s30  ;;  %v1877_v56 = vrot.slane %v4737_v25, 7  ;;  %v1957_v29 = vrot.slane %v4737_v25, 1 }
 0x3cd   : > { %2174 = vrot.lane.b32.xlu2 %v1990_v4, %s3730_s20 }
 0x3ce   : > { %v1919_v24 = vsel %vm834_vm3, 0.0, %v1877_v56 }
 0x3d0   : > { %v4732_v31 = vpop.f32.mrf.mxu1 }
 0x3d1   : > { %v1854_v37 = vrot.slane %v4732_v31, 7  ;;  %v1934_v48 = vrot.slane %v4732_v31, 1 }
 0x3d3   : > { %v1855_v26 = vsel %vm834_vm3, %v1853_v27, %v1854_v37  ;;  %v1991_v59 = vsel %vm915_vm4, %v1934_v48, 0.0  ;;  %v1935_v10 = vsel %vm915_vm4, %v1933_v11, %v1934_v48  ;;  %v4752_v1 = vpop.f32.mrf.mxu3 }
 0x3d4   : > { %2060 = vrot.lane.b32.xlu0 %v1918_v7, %s3728_s30  ;;  %2032 = vrot.lane.b32.xlu1 %v1911_v51, %s3728_s30  ;;  %v1958_v33 = vrot.slane %v4752_v1, 1  ;;  %v1878_v23 = vrot.slane %v4752_v1, 7 }
 0x3d5   : > { %2204 = vrot.lane.b32.xlu2 %v1956_v35, %s3730_s20 }
 0x3d6   : > { %v1959_v30 = vsel %vm915_vm4, %v1957_v29, %v1958_v33  ;;  %v1999_v47 = vsel %vm915_vm4, %v1958_v33, 0.0  ;;  %v1879_v18 = vsel %vm834_vm3, %v1877_v56, %v1878_v23 }
 0x3d8   : > { %v4748_v54 = vpop.f32.mrf.mxu1 }
 0x3d9   : > { %v1856_v8 = vrot.slane %v4748_v54, 7  ;;  %v1936_v49 = vrot.slane %v4748_v54, 1 }
 0x3db   : > { %v1912_v32 = vsel %vm834_vm3, 0.0, %v1856_v8  ;;  %v4772_v17 = vpop.f32.mrf.mxu3 }
 0x3dc   : > { %2206 = vrot.lane.b32.xlu0 %v1998_v43, %s3730_s20  ;;  %2062 = vrot.lane.b32.xlu1 %v1876_v61, %s3728_s30  ;;  %v1880_v39 = vrot.slane %v4772_v17, 7  ;;  %v1960_v53 = vrot.slane %v4772_v17, 1 }
 0x3dd   : > { %2034 = vrot.lane.b32.xlu2 %v1855_v26, %s3728_s30 }
 0x3de   : > { %v1920_v21 = vsel %vm834_vm3, 0.0, %v1880_v39 }
 0x3e0   : > { %v4761_v0 = vpop.f32.mrf.mxu1 }
 0x3e1   : > { %v1857_v62 = vrot.slane %v4761_v0, 7  ;;  %v1937_v15 = vrot.slane %v4761_v0, 1 }
 0x3e3   : > { %v1858_v16 = vsel %vm834_vm3, %v1856_v8, %v1857_v62  ;;  %v1938_v13 = vsel %vm915_vm4, %v1936_v49, %v1937_v15  ;;  %v4787_v46 = vpop.f32.mrf.mxu3  ;;  %v1992_v58 = vsel %vm915_vm4, %v1937_v15, 0.0 }
 0x3e4   : > { %2178 = vrot.lane.b32.xlu1 %v1991_v59, %s3730_s20  ;;  %2176 = vrot.lane.b32.xlu0 %v1935_v10, %s3730_s20  ;;  %v1961_v60 = vrot.slane %v4787_v46, 1  ;;  %v1881_v63 = vrot.slane %v4787_v46, 7 }
 0x3e5   : > { %2064 = vrot.lane.b32.xlu2 %v1919_v24, %s3728_s30 }
 0x3e6   : > { %v1962_v12 = vsel %vm915_vm4, %v1960_v53, %v1961_v60  ;;  %v2000_v27 = vsel %vm915_vm4, %v1961_v60, 0.0  ;;  %v1882_v45 = vsel %vm834_vm3, %v1880_v39, %v1881_v63 }
 0x3e8   : > { %v4780_v19 = vpop.f32.mrf.mxu1 }
 0x3e9   : > { %v1859_v38 = vrot.slane %v4780_v19, 7  ;;  %v1939_v35 = vrot.slane %v4780_v19, 1 }
 0x3eb   : > { %v1913_v57 = vsel %vm834_vm3, 0.0, %v1859_v38 }
 0x3ec   : > { %2208 = vrot.lane.b32.xlu1 %v1959_v30, %s3730_s20  ;;  %2036 = vrot.lane.b32.xlu0 %v1912_v32, %s3728_s30 }
 0x3ed   : > { %2210 = vrot.lane.b32.xlu2 %v1999_v47, %s3730_s20 }
 0x3f0   : > { %v4800_v9 = vpop.f32.mrf.mxu1 }
 0x3f1   : > { %v1860_v20 = vrot.slane %v4800_v9, 7  ;;  %v1940_v7 = vrot.slane %v4800_v9, 1 }
 0x3f3   : > { %v1941_v37 = vsel %vm915_vm4, %v1939_v35, %v1940_v7  ;;  %v1861_v43 = vsel %vm834_vm3, %v1859_v38, %v1860_v20  ;;  %v1993_v26 = vsel %vm915_vm4, %v1940_v7, 0.0 }
 0x3f4   : > { %2066 = vrot.lane.b32.xlu0 %v1879_v18, %s3728_s30  ;;  %2038 = vrot.lane.b32.xlu1 %v1858_v16, %s3728_s30 }
 0x3f5   : > { %2180 = vrot.lane.b32.xlu2 %v1938_v13, %s3730_s20 }
 0x3f7   : > { %v4784_v3 = vpop.permute.xlu2 %2022 }
 0x3fc   : > { %2182 = vrot.lane.b32.xlu0 %v1992_v58, %s3730_s20  ;;  %2068 = vrot.lane.b32.xlu1 %v1920_v21, %s3728_s30 }
 0x3fd   : > { %2040 = vrot.lane.b32.xlu2 %v1913_v57, %s3728_s30 }
 0x3ff   : > { %v4796_v2 = vpop.permute.xlu2 %2052 }
 0x401   : > { %v4802_v4 = vpop.f32.mrf.mxu3 }
 0x402   : > { %v1883_v56 = vrot.slane %v4802_v4, 7  ;;  %v1963_v24 = vrot.slane %v4802_v4, 1 }
 0x403   : > { %v4815_v44 = vpop.f32.mrf.mxu1 }
 0x404   : > { %2212 = vrot.lane.b32.xlu0 %v1962_v12, %s3730_s20  ;;  %2214 = vrot.lane.b32.xlu1 %v2000_v27, %s3730_s20  ;;  %v1862_v11 = vrot.slane %v4815_v44, 7  ;;  %v1921_v8 = vsel %vm834_vm3, 0.0, %v1883_v56  ;;  %v1942_v60 = vrot.slane %v4815_v44, 1 }
 0x405   : > { %2070 = vrot.lane.b32.xlu2 %v1882_v45, %s3728_s30 }
 0x406   : > { %v4819_v61 = vpop.permute.xlu1 %2020  ;;  %v1914_v33 = vsel %vm834_vm3, 0.0, %v1862_v11 }
 0x407   : > { %v4812_v51 = vpop.permute.xlu2 %2198 }
 0x409   : > { %v4824_v48 = vpop.f32.mrf.mxu3 }
 0x40a   : > { %v1964_v10 = vrot.slane %v4824_v48, 1  ;;  %v1884_v23 = vrot.slane %v4824_v48, 7 }
 0x40b   : > { %v4838_v30 = vpop.f32.mrf.mxu1 }
 0x40c   : > { %2184 = vrot.lane.b32.xlu1 %v1941_v37, %s3730_s20  ;;  %2042 = vrot.lane.b32.xlu0 %v1861_v43, %s3728_s30  ;;  %v1965_v29 = vsel %vm915_vm4, %v1963_v24, %v1964_v10  ;;  %v1863_v15 = vrot.slane %v4838_v30, 7  ;;  %v2001_v18 = vsel %vm915_vm4, %v1964_v10, 0.0  ;;  %v1885_v16 = vsel %vm834_vm3, %v1883_v56, %v1884_v23 }
 0x40d   : > { %2186 = vrot.lane.b32.xlu2 %v1993_v26, %s3730_s20  ;;  %v1943_v58 = vrot.slane %v4838_v30, 1 }
 0x40e   : > { %v4841_v32 = vpop.permute.xlu1 %2166  ;;  %v2165_v47 = vpop.permute.xlu0 %2164  ;;  %v1864_v13 = vsel %vm834_vm3, %v1862_v11, %v1863_v15 }
 0x40f   : > { %v4829_v59 = vpop.permute.xlu2 %2168  ;;  %v1944_v53 = vsel %vm915_vm4, %v1942_v60, %v1943_v58  ;;  %v1994_v12 = vsel %vm915_vm4, %v1943_v58, 0.0 }
 0x411   : > { %v4847_v49 = vpop.f32.mrf.mxu3 }
 0x412   : > { %v1886_v57 = vrot.slane %v4847_v49, 7  ;;  %v1966_v26 = vrot.slane %v4847_v49, 1 }
 0x413   : > { %v4864_v63 = vpop.f32.mrf.mxu1 }
 0x414   : > { %2044 = vrot.lane.b32.xlu1 %v1914_v33, %s3728_s30  ;;  %2072 = vrot.lane.b32.xlu0 %v1921_v8, %s3728_s30  ;;  %v1922_v45 = vsel %vm834_vm3, 0.0, %v1886_v57  ;;  %v1865_v35 = vrot.slane %v4864_v63, 7 }
 0x415   : > { %2216 = vrot.lane.b32.xlu2 %v1965_v29, %s3730_s20 }
 0x416   : > { %v1915_v56 = vsel %vm834_vm3, 0.0, %v1865_v35 }
 0x417   : > { %v4844_v62 = vpop.permute.xlu2 %2028 }
 0x418   : > { %v4855_v39 = vpop.permute.xlu1 %2196 }
 0x419   : > { %v4868_v27 = vpop.f32.mrf.mxu3 }
 0x41a   : > { %v1967_v37 = vrot.slane %v4868_v27, 1  ;;  %v1887_v29 = vrot.slane %v4868_v27, 7 }
 0x41b   : > { %v4881_v10 = vpop.f32.mrf.mxu1 }
 0x41c   : > { %2218 = vrot.lane.b32.xlu0 %v2001_v18, %s3730_s20  ;;  %2074 = vrot.lane.b32.xlu1 %v1885_v16, %s3728_s30  ;;  %v1968_v11 = vsel %vm915_vm4, %v1966_v26, %v1967_v37  ;;  %v2002_v24 = vsel %vm915_vm4, %v1967_v37, 0.0  ;;  %v1866_v23 = vrot.slane %v4881_v10, 7  ;;  %v1946_v18 = vrot.slane %v4881_v10, 1 }
 0x41d   : > { %2046 = vrot.lane.b32.xlu2 %v1864_v13, %s3728_s30  ;;  %v1945_v16 = vrot.slane %v4864_v63, 1  ;;  %v1888_v60 = vsel %vm834_vm3, %v1886_v57, %v1887_v29 }
 0x41e   : > { %v4857_v38 = vpop.permute.xlu0 %2024  ;;  %v1867_v58 = vsel %vm834_vm3, %v1865_v35, %v1866_v23  ;;  %v1995_v57 = vsel %vm915_vm4, %v1946_v18, 0.0 }
 0x41f   : > { %v4860_v21 = vpop.permute.xlu2 %2058 }
 0x421   : > { %v4893_v13 = vpop.f32.mrf.mxu3 }
 0x422   : > { %v1889_v37 = vrot.slane %v4893_v13, 7 }
 0x424   : > { %2188 = vrot.lane.b32.xlu0 %v1944_v53, %s3730_s20  ;;  %2190 = vrot.lane.b32.xlu1 %v1994_v12, %s3730_s20  ;;  %v1947_v53 = vsel %vm915_vm4, %v1945_v16, %v1946_v18 }
 0x425   : > { %2076 = vrot.lane.b32.xlu2 %v1922_v45, %s3728_s30 }
 0x426   : > { %v2055_v20 = vpop.permute.xlu0 %2054  ;;  %v2027_v7 = vpop.permute.xlu1 %2026 }
 0x427   : > { %v4876_v43 = vpop.permute.xlu2 %2174 }
 0x42c   : > { %2048 = vrot.lane.b32.xlu0 %v1915_v56, %s3728_s30  ;;  %2220 = vrot.lane.b32.xlu1 %v1968_v11, %s3730_s20  ;;  %v2116_v56 = vadd.f32 %v4819_v61, %v4628_v52  ;;  %v1923_v11 = vsel %vm834_vm3, 0.0, %v1889_v37  ;;  %v2117_v52 = vadd.f32 %v4784_v3, %v4637_v40  ;;  %v1969_v40 = vrot.slane %v4893_v13, 1 }
 0x42d   : > { %2222 = vrot.lane.b32.xlu2 %v2002_v24, %s3730_s20  ;;  %v4908_v24 = vpop.f32.mrf.mxu3  ;;  %v2119_v3 = vadd.f32 %v2027_v7, %v4674_v6  ;;  %v2132_v6 = vadd.f32 %v4796_v2, %v4644_v41 }
 0x42e   : > { %v2171_v33 = vpop.permute.xlu0 %2170  ;;  %v2057_v8 = vpop.permute.xlu1 %2056  ;;  %v2260_v35 = vadd.f32 %v2165_v47, %v2116_v56  ;;  %v1970_v16 = vrot.slane %v4908_v24, 1  ;;  %v1890_v61 = vrot.slane %v4908_v24, 7  ;;  %v2261_v47 = vadd.f32 %v4841_v32, %v2117_v52 }
 0x42f   : > { %v4889_v15 = vpop.permute.xlu2 %2204  ;;  %v2276_v7 = vadd.f32 %v4855_v39, %v2132_v6 }
 0x430   : > { %v2003_v18 = vsel %vm915_vm4, %v1970_v16, 0.0  ;;  %v1971_v52 = vsel %vm915_vm4, %v1969_v40, %v1970_v16 }
 0x434   : > { %2050 = vrot.lane.b32.xlu1 %v1867_v58, %s3728_s30  ;;  %2078 = vrot.lane.b32.xlu0 %v1888_v60, %s3728_s30  ;;  %v1891_v60 = vsel %vm834_vm3, %v1889_v37, %v1890_v61 }
 0x435   : > { %2192 = vrot.lane.b32.xlu2 %v1947_v53, %s3730_s20  ;;  %v2133_v53 = vadd.f32 %v2055_v20, %v4656_v34  ;;  %v2118_v34 = vadd.f32 %v4857_v38, %v4664_v22 }
 0x436   : > { %v2203_v12 = vpop.permute.xlu1 %2202  ;;  %v2201_v45 = vpop.permute.xlu0 %2200 }
 0x437   : > { %v4902_v26 = vpop.permute.xlu2 %2034  ;;  %v2277_v32 = vadd.f32 %v4812_v51, %v2133_v53  ;;  %v2134_v51 = vadd.f32 %v2057_v8, %v4672_v50  ;;  %v2135_v50 = vadd.f32 %v4860_v21, %v4688_v14 }
 0x439   : > { %v2278_v16 = vadd.f32 %v2201_v45, %v2134_v51  ;;  %v2279_v2 = vadd.f32 %v2203_v12, %v2135_v50 }
 0x43c   : > { %2194 = vrot.lane.b32.xlu0 %v1995_v57, %s3730_s20  ;;  %2080 = vrot.lane.b32.xlu1 %v1923_v11, %s3728_s30  ;;  %v2263_v11 = vadd.f32 %v2171_v33, %v2119_v3  ;;  %v2262_v33 = vadd.f32 %v4829_v59, %v2118_v34 }
 0x43d   : > { %2324 = vrot.lane.b32.xlu2 %v2260_v35, %s3730_s20 }
 0x43e   : > { %v2173_v29 = vpop.permute.xlu1 %2172  ;;  %v2031_v23 = vpop.permute.xlu0 %2030 }
 0x43f   : > { %v4914_v58 = vpop.permute.xlu2 %2064  ;;  %v2121_v22 = vadd.f32 %v2031_v23, %v4700_v28 }
 0x441   : > { %v2265_v59 = vadd.f32 %v4876_v43, %v2121_v22 }
 0x444   : > { %2226 = vrot.lane.b32.xlu1 %v2003_v18, %s3730_s20  ;;  %2326 = vrot.lane.b32.xlu0 %v2261_v47, %s3730_s20 }
 0x445   : > { %2082 = vrot.lane.b32.xlu2 %v1891_v60, %s3728_s30 }
 0x446   : > { %v2061_v56 = vpop.permute.xlu0 %2060  ;;  %v2033_v35 = vpop.permute.xlu1 %2032 }
 0x447   : > { %v2211_v57 = vpop.permute.xlu2 %2210  ;;  %v2136_v28 = vadd.f32 %v2061_v56, %v4702_v55  ;;  %v2122_v14 = vadd.f32 %v2033_v35, %v4713_v5 }
 0x449   : > { %v2280_v43 = vadd.f32 %v4889_v15, %v2136_v28 }
 0x44c   : > { %2224 = vrot.lane.b32.xlu0 %v1971_v52, %s3730_s20  ;;  %2358 = vrot.lane.b32.xlu1 %v2277_v32, %s3730_s20 }
 0x44d   : > { %2330 = vrot.lane.b32.xlu2 %v2263_v11, %s3730_s20 }
 0x44e   : > { %v2207_v20 = vpop.permute.xlu0 %2206  ;;  %v2063_v37 = vpop.permute.xlu1 %2062 }
 0x44f   : > { %v2181_v61 = vpop.permute.xlu2 %2180  ;;  %v2137_v18 = vadd.f32 %v2063_v37, %v4720_v42  ;;  %v2120_v42 = vadd.f32 %v4844_v62, %v4686_v36  ;;  %v2123_v36 = vadd.f32 %v4902_v26, %v4732_v31 }
 0x451   : > { %v2281_v39 = vadd.f32 %v2207_v20, %v2137_v18  ;;  %v2264_v21 = vadd.f32 %v2173_v29, %v2120_v42 }
 0x454   : > { %2356 = vrot.lane.b32.xlu0 %v2276_v7, %s3730_s20  ;;  %2328 = vrot.lane.b32.xlu1 %v2262_v33, %s3730_s20 }
 0x455   : > { %2360 = vrot.lane.b32.xlu2 %v2278_v16, %s3730_s20 }
 0x456   : > { %v2179_v38 = vpop.permute.xlu1 %2178  ;;  %v2177_v47 = vpop.permute.xlu0 %2176 }
 0x457   : > { %v2041_v41 = vpop.permute.xlu2 %2040  ;;  %v2266_v12 = vadd.f32 %v2177_v47, %v2122_v14  ;;  %v2267_v5 = vadd.f32 %v2179_v38, %v2123_v36 }
 0x458   : > { %v2126_v6 = vadd.f32 %v2041_v41, %v4780_v19 }
 0x45c   : > { %2362 = vrot.lane.b32.xlu0 %v2279_v2, %s3730_s20  ;;  %2334 = vrot.lane.b32.xlu1 %v2265_v59, %s3730_s20 }
 0x45d   : > { %2366 = vrot.lane.b32.xlu2 %v2281_v39, %s3730_s20 }
 0x45e   : > { %v2209_v8 = vpop.permute.xlu1 %2208  ;;  %v2037_v45 = vpop.permute.xlu0 %2036 }
 0x45f   : > { %v2071_v23 = vpop.permute.xlu2 %2070  ;;  %v2124_v29 = vadd.f32 %v2037_v45, %v4748_v54 }
 0x460   : > { %v2141_v34 = vadd.f32 %v2071_v23, %v4787_v46 }
 0x461   : > { %v2268_v26 = vadd.f32 %v2181_v61, %v2124_v29 }
 0x464   : > { %2332 = vrot.lane.b32.xlu0 %v2264_v21, %s3730_s20  ;;  %2364 = vrot.lane.b32.xlu1 %v2280_v43, %s3730_s20 }
 0x465   : > { %2336 = vrot.lane.b32.xlu2 %v2266_v12, %s3730_s20 }
 0x466   : > { %v2067_v60 = vpop.permute.xlu0 %2066  ;;  %v2039_v55 = vpop.permute.xlu1 %2038 }
 0x467   : > { %v2139_v53 = vadd.f32 %v2067_v60, %v4752_v1  ;;  %v2187_v56 = vpop.permute.xlu2 %2186  ;;  %v2125_v15 = vadd.f32 %v2039_v55, %v4761_v0  ;;  %v2138_v1 = vadd.f32 %v4914_v58, %v4737_v25 }
 0x469   : > { %v2283_v62 = vadd.f32 %v2211_v57, %v2139_v53  ;;  %v2282_v31 = vadd.f32 %v2209_v8, %v2138_v1 }
 0x46c   : > { %2338 = vrot.lane.b32.xlu0 %v2267_v5, %s3730_s20  ;;  %2370 = vrot.lane.b32.xlu1 %v2283_v62, %s3730_s20 }
 0x46e   : > { %v2183_v35 = vpop.permute.xlu0 %2182  ;;  %v2069_v40 = vpop.permute.xlu1 %2068 }
 0x46f   : > { %v2269_v3 = vadd.f32 %v2183_v35, %v2125_v15  ;;  %v2217_v32 = vpop.permute.xlu2 %2216  ;;  %v2140_v57 = vadd.f32 %v2069_v40, %v4772_v17 }
 0x471   : > { %2342 = vrot.lane.b32.xlu2 %v2269_v3, %s3730_s20 }
 0x474   : > { %2368 = vrot.lane.b32.xlu0 %v2282_v31, %s3730_s20  ;;  %2340 = vrot.lane.b32.xlu1 %v2268_v26, %s3730_s20 }
 0x476   : > { %v2213_v0 = vpop.permute.xlu0 %2212  ;;  %v2215_v11 = vpop.permute.xlu1 %2214 }
 0x477   : > { %v2284_v54 = vadd.f32 %v2213_v0, %v2140_v57  ;;  %v2047_v52 = vpop.permute.xlu2 %2046  ;;  %v2285_v20 = vadd.f32 %v2215_v11, %v2141_v34 }
 0x478   : > { %v2129_v41 = vadd.f32 %v2047_v52, %v4838_v30 }
 0x479   : > { %2372 = vrot.lane.b32.xlu2 %v2284_v54, %s3730_s20 }
 0x47c   : > { %2374 = vrot.lane.b32.xlu0 %v2285_v20, %s3730_s20  ;;  %v3732_v20 = vmov 1983009808  }
 0x47e   : > { %v2185_v25 = vpop.permute.xlu1 %2184  ;;  %v2043_v58 = vpop.permute.xlu0 %2042 }
 0x47f   : > { %v2127_v37 = vadd.f32 %v2043_v58, %v4800_v9  ;;  %v2077_v61 = vpop.permute.xlu2 %2076  ;;  %v2270_v17 = vadd.f32 %v2185_v25, %v2126_v6  ;;  %v2426_v25 = vunpack.c.l.s4 %v3732_v20 }
 0x481   : > { %v2271_v51 = vadd.f32 %v2187_v56, %v2127_v37 }
 0x483   : > { %2346 = vrot.lane.b32.xlu1 %v2271_v51, %s3730_s20  ;;  %v5016_v51 = vunpack.c.0.s8 %v2426_v25 }
 0x484   : > { %2344 = vrot.lane.b32.xlu0 %v2270_v17, %s3730_s20 }
 0x486   : > { %v2045_v7 = vpop.permute.xlu1 %2044  ;;  %v2073_v46 = vpop.permute.xlu0 %2072 }
 0x487   : > { %v2142_v33 = vadd.f32 %v2073_v46, %v4802_v4  ;;  %v2223_v16 = vpop.permute.xlu2 %2222  ;;  %v2128_v50 = vadd.f32 %v2045_v7, %v4815_v44 }
 0x489   : > { %v2286_v22 = vadd.f32 %v2217_v32, %v2142_v33 }
 0x48c   : > { %2376 = vrot.lane.b32.xlu0 %v2286_v22, %s3730_s20 }
 0x48e   : > { %v2219_v38 = vpop.permute.xlu0 %2218  ;;  %v2075_v47 = vpop.permute.xlu1 %2074 }
 0x48f   : > { %v2143_v9 = vadd.f32 %v2075_v47, %v4824_v48  ;;  %v2193_v18 = vpop.permute.xlu2 %2192  ;;  %v2144_v48 = vadd.f32 %v2077_v61, %v4847_v49 }
 0x491   : > { %v2287_v19 = vadd.f32 %v2219_v38, %v2143_v9 }
 0x493   : > { %2378 = vrot.lane.b32.xlu1 %v2287_v19, %s3730_s20 }
 0x496   : > { %v2189_v2 = vpop.permute.xlu0 %2188  ;;  %v2191_v59 = vpop.permute.xlu1 %2190 }
 0x497   : > { %v2272_v39 = vadd.f32 %v2189_v2, %v2128_v50  ;;  %v2273_v4 = vadd.f32 %v2191_v59, %v2129_v41  ;;  %v4985_v28 = vpop.permute.xlu2 %2324 }
 0x499   : > { %2348 = vrot.lane.b32.xlu2 %v2272_v39, %s3730_s20  ;;  %2350 = vrot.lane.b32.xlu0 %v2273_v4, %s3730_s20 }
 0x49e   : > { %v2049_v8 = vpop.permute.xlu0 %2048  ;;  %v2221_v45 = vpop.permute.xlu1 %2220 }
 0x49f   : > { %v2288_v23 = vadd.f32 %v2221_v45, %v2144_v48  ;;  %v2083_v42 = vpop.permute.xlu2 %2082  ;;  %v2130_v44 = vadd.f32 %v2049_v8, %v4864_v63 }
 0x4a0   : > { %v2147_v63 = vadd.f32 %v2083_v42, %v4908_v24 }
 0x4a1   : > { %2380 = vrot.lane.b32.xlu1 %v2288_v23, %s3730_s20  ;;  %v2274_v21 = vadd.f32 %v2193_v18, %v2130_v44 }
 0x4a6   : > { %v2051_v30 = vpop.permute.xlu1 %2050  ;;  %v2079_v14 = vpop.permute.xlu0 %2078 }
 0x4a7   : > { %v2145_v43 = vadd.f32 %v2079_v14, %v4868_v27  ;;  %v4993_v12 = vpop.permute.xlu2 %2330  ;;  %v2131_v53 = vadd.f32 %v2051_v30, %v4881_v10 }
 0x4a9   : > { %v2289_v60 = vadd.f32 %v2223_v16, %v2145_v43  ;;  %2352 = vrot.lane.b32.xlu1 %v2274_v21, %s3730_s20 }
 0x4ab   : > { %2382 = vrot.lane.b32.xlu2 %v2289_v60, %s3730_s20 }
 0x4ae   : > { %v2195_v49 = vpop.permute.xlu0 %2194  ;;  %v2081_v55 = vpop.permute.xlu1 %2080 }
 0x4af   : > { %v4998_v56 = vpop.permute.xlu2 %2360  ;;  %v2275_v36 = vadd.f32 %v2195_v49, %v2131_v53  ;;  %v2146_v29 = vadd.f32 %v2081_v55, %v4893_v13 }
 0x4b0   : > { %v2547_v21 = vrot.slane %v4998_v56, 4 }
 0x4b3   : > { %2354 = vrot.lane.b32.xlu2 %v2275_v36, %s3730_s20 }
 0x4b6   : > { %v2227_v62 = vpop.permute.xlu1 %2226  ;;  %v2327_v27 = vpop.permute.xlu0 %2326 }
 0x4b7   : > { %v2291_v5 = vadd.f32 %v2227_v62, %v2147_v63  ;;  %v2367_v15 = vpop.permute.xlu2 %2366  ;;  %v2647_v57 = vrot.slane %v2327_v27, 4 }
 0x4b8   : > { %v2757_v35 = vrot.slane %v2367_v15, 4 }
 0x4b9   : > { %2386 = vrot.lane.b32.xlu0 %v2291_v5, %s3730_s20 }
 0x4be   : > { %v2225_v40 = vpop.permute.xlu0 %2224  ;;  %v2359_v3 = vpop.permute.xlu1 %2358 }
 0x4bf   : > { %v2290_v10 = vadd.f32 %v2225_v40, %v2146_v29  ;;  %v2758_v32 = vsel %vm2421_vm5, %v2757_v35, %v2359_v3  ;;  %v2759_v1 = vrot.slane %v2359_v3, 4  ;;  %v5029_v8 = vpop.permute.xlu2 %2336 }
 0x4c0   : > { %v2764_v38 = vperm.slane %v2758_v32, %v5016_v51 }
 0x4c1   : > { %v2760_v31 = vsel %vm2421_vm5, %v2367_v15, %v2759_v1  ;;  %2384 = vrot.lane.b32.xlu2 %v2290_v10, %s3730_s20 }
 0x4c2   : > { %v2768_v7 = vperm.slane %v2760_v31, %v5016_v51  ;;  %v2807_v48 = vrot.slane %v2764_v38, 4 }
 0x4c4   : > { %v2819_v41 = vrot.slane %v2768_v7, 4 }
 0x4c6   : > { %v2357_v24 = vpop.permute.xlu0 %2356  ;;  %v5007_v26 = vpop.permute.xlu1 %2328 }
 0x4c7   : > { %v2535_v13 = vrot.slane %v2357_v24, 4 }
 0x4cb   : > { %v2343_v10 = vpop.permute.xlu2 %2342 }
 0x4ce   : > { %v2363_v0 = vpop.permute.xlu0 %2362  ;;  %v2335_v11 = vpop.permute.xlu1 %2334 }
 0x4cf   : > { %v5010_v54 = vsel %vm2421_vm5, %v2335_v11, %v2647_v57  ;;  %v2645_v58 = vrot.slane %v2335_v11, 4  ;;  %v2771_v46 = vrot.slane %v2363_v0, 4 }
 0x4d1   : > { %v2646_v17 = vsel %vm2421_vm5, %v2645_v58, %v2327_v27  ;;  %v2659_v58 = vrot.slane %v4993_v12, 4 }
 0x4d2   : > { %v2652_v33 = vperm.slane %v2646_v17, %v5016_v51  ;;  %v3733_v17 = vmov 1934713408  }
 0x4d4   : > { %v2695_v59 = vrot.slane %v2652_v33, 4 }
 0x4d6   : > { %v5012_v52 = vpop.permute.xlu0 %2332  ;;  %v2365_v34 = vpop.permute.xlu1 %2364 }
 0x4d7   : > { %v2533_v37 = vrot.slane %v2365_v34, 4  ;;  %v2536_v61 = vsel %vm2421_vm5, %v2365_v34, %v2535_v13 }
 0x4d8   : > { %v2544_v42 = vperm.slane %v2536_v61, %v5016_v51  ;;  %v2423_v61 = vrot.slane %v4985_v28, 4 }
 0x4d9   : > { %v2534_v6 = vsel %vm2421_vm5, %v2533_v37, %v2357_v24  ;;  %v2420_v37 = vrot.slane %v5012_v52, 4 }
 0x4da   : > { %v2540_v49 = vperm.slane %v2534_v6, %v5016_v51  ;;  %v2595_v27 = vrot.slane %v2544_v42, 4 }
 0x4dc   : > { %v2583_v29 = vrot.slane %v2540_v49, 4 }
 0x4de   : > { %v2339_v16 = vpop.permute.xlu0 %2338  ;;  %v2371_v22 = vpop.permute.xlu1 %2370 }
 0x4df   : > { %v2657_v47 = vrot.slane %v2339_v16, 4  ;;  %v2769_v9 = vrot.slane %v2371_v22, 4  ;;  %v2772_v18 = vsel %vm2421_vm5, %v2371_v22, %v2771_v46  ;;  %v2660_v6 = vsel %vm2421_vm5, %v2339_v16, %v2659_v58 }
 0x4e0   : > { %v2780_v19 = vperm.slane %v2772_v18, %v5016_v51  ;;  %v2424_v46 = vsel %vm2421_vm5, %v5012_v52, %v2423_v61  ;;  %v2433_v18 = vrot.slane %v5029_v8, 4  ;;  %v5092_v16 = vperm.slane %v2660_v6, %v5016_v51 }
 0x4e1   : > { %v2658_v50 = vsel %vm2421_vm5, %v2657_v47, %v4993_v12  ;;  %v2770_v2 = vsel %vm2421_vm5, %v2769_v9, %v2363_v0  ;;  %v2422_v47 = vsel %vm2421_vm5, %v2420_v37, %v4985_v28 }
 0x4e2   : > { %v2664_v39 = vperm.slane %v2658_v50, %v5016_v51  ;;  %v2776_v4 = vperm.slane %v2770_v2, %v5016_v51  ;;  %v2817_v45 = vrot.slane %v2780_v19, 4  ;;  %v5032_v23 = vsel %vm2421_vm5, %v2780_v19, %v2819_v41 }
 0x4e3   : > { %v2435_v19 = vrot.slane %v5007_v26, 4  ;;  %v5095_v50 = vperm.slane %v2424_v46, %v5016_v51  ;;  %v5100_v28 = vperm.slane %v2422_v47, %v5016_v51 }
 0x4e4   : > { %v2693_v44 = vrot.slane %v2664_v39, 4  ;;  %v2805_v30 = vrot.slane %v2776_v4, 4  ;;  %v5036_v14 = vsel %vm2421_vm5, %v2664_v39, %v2695_v59  ;;  %v5040_v43 = vsel %vm2421_vm5, %v2817_v45, %v2768_v7 }
 0x4e5   : > { %v5043_v60 = vsel %vm2421_vm5, %v2776_v4, %v2807_v48  ;;  %v2474_v7 = vunpack.c.l.s4 %v3733_v17  ;;  %v2434_v4 = vsel %vm2421_vm5, %v2433_v18, %v5007_v26  ;;  %v5123_v26 = vperm.slane %v5010_v54, %v5016_v51 }
 0x4e6   : > { %v2369_v55 = vpop.permute.xlu0 %2368  ;;  %v5047_v53 = vsel %vm2421_vm5, %v2693_v44, %v2652_v33  ;;  %v5050_v36 = vsel %vm2421_vm5, %v2805_v30, %v2764_v38  ;;  %v2341_v11 = vpop.permute.xlu1 %2340  ;;  %v2671_v38 = vrot.slane %v2343_v10, 4  ;;  %v2705_v44 = vrot.slane %v5092_v16, 4 }
 0x4e7   : > { %v2545_v63 = vrot.slane %v2369_v55, 4  ;;  %v2548_v62 = vsel %vm2421_vm5, %v2369_v55, %v2547_v21  ;;  %v5107_v48 = vunpack.c.0.s8 %v2474_v7  ;;  %v2436_v55 = vsel %vm2421_vm5, %v5029_v8, %v2435_v19 }
 0x4e8   : > { %v2556_v5 = vperm.slane %v2548_v62, %v5016_v51  ;;  %v5137_v54 = vperm.slane %v2434_v4, %v5016_v51 }
 0x4e9   : > { %v2546_v15 = vsel %vm2421_vm5, %v2545_v63, %v4998_v56  ;;  %v5071_v56 = vpop.permute.xlu2 %2372  ;;  %v2483_v63 = vrot.slane %v5095_v50, 4  ;;  %v5157_v46 = vperm.slane %v5047_v53, %v5107_v48 }
 0x4ea   : > { %v2552_v35 = vperm.slane %v2546_v15, %v5016_v51  ;;  %v2593_v40 = vrot.slane %v2556_v5, 4  ;;  %v5058_v3 = vsel %vm2421_vm5, %v2556_v5, %v2595_v27  ;;  %v2471_v27 = vrot.slane %v5100_v28, 4 }
 0x4eb   : > { %v2559_v19 = vrot.slane %v5071_v56, 4 }
 0x4ec   : > { %v2581_v32 = vrot.slane %v2552_v35, 4  ;;  %v5061_v1 = vsel %vm2421_vm5, %v2593_v40, %v2544_v42  ;;  %v5064_v31 = vsel %vm2421_vm5, %v2552_v35, %v2583_v29  ;;  %v2447_v40 = vrot.slane %v2341_v11, 4 }
 0x4ed   : > { %v2472_v17 = vsel %vm2421_vm5, %v5137_v54, %v2471_v27 }
 0x4ee   : > { %v5067_v24 = vsel %vm2421_vm5, %v2581_v32, %v2540_v49  ;;  %v5069_v57 = vpop.permute.xlu0 %2374  ;;  %v2706_v32 = vsel %vm2421_vm5, %v2705_v44, %v5123_v26 }
 0x4ef   : > { %v5153_v7 = vperm.slane %v2706_v32, %v5107_v48 }
 0x4f3   : > { %v2349_v13 = vpop.permute.xlu2 %2348 }
 0x4f4   : > { %v2445_v62 = vrot.slane %v2349_v13, 4  ;;  %v2448_v37 = vsel %vm2421_vm5, %v2349_v13, %v2447_v40 }
 0x4f5   : > { %v2347_v34 = vpop.permute.xlu1 %2346 }
 0x4f6   : > { %v5073_v0 = vpop.permute.xlu0 %2344  ;;  %v2683_v9 = vrot.slane %v2347_v34, 4  ;;  %v2446_v58 = vsel %vm2421_vm5, %v2445_v62, %v2341_v11 }
 0x4f7   : > { %v5162_v13 = vperm.slane %v2446_v58, %v5016_v51  ;;  %v2459_v47 = vrot.slane %v5073_v0, 4 }
 0x4f9   : > { %v2495_v27 = vrot.slane %v5162_v13, 4 }
 0x4fe   : > { %v5075_v20 = vpop.permute.xlu0 %2376 }
 0x505   : > { %v5077_v25 = vpop.permute.xlu2 %2382  ;;  %v5085_v33 = vpop.permute.xlu1 %2378 }
 0x50b   : > { %v2351_v22 = vpop.permute.xlu0 %2350 }
 0x50c   : > { %v2669_v12 = vrot.slane %v2351_v22, 4  ;;  %v2672_v52 = vsel %vm2421_vm5, %v2351_v22, %v2671_v38  ;;  %v2456_v38 = vperm.slane %v2448_v37, %v5016_v51 }
 0x50d   : > { %v2355_v41 = vpop.permute.xlu2 %2354  ;;  %v5113_v30 = vperm.slane %v2672_v52, %v5016_v51 }
 0x50e   : > { %v2681_v2 = vrot.slane %v2355_v41, 4  ;;  %v2684_v59 = vsel %vm2421_vm5, %v2355_v41, %v2683_v9  ;;  %v2670_v45 = vsel %vm2421_vm5, %v2669_v12, %v2343_v10  ;;  %v2444_v10 = vperm.slane %v2436_v55, %v5016_v51 }
 0x50f   : > { %v5103_v39 = vperm.slane %v2684_v59, %v5016_v51  ;;  %v5128_v5 = vperm.slane %v2670_v45, %v5016_v51  ;;  %v2571_v9 = vrot.slane %v5075_v20, 4  ;;  %v2480_v59 = vperm.slane %v2472_v17, %v5107_v48 }
 0x510   : > { %v2682_v42 = vsel %vm2421_vm5, %v2681_v2, %v2347_v34  ;;  %v2484_v6 = vsel %vm2421_vm5, %v2444_v10, %v2483_v63  ;;  %v2481_v18 = vrot.slane %v2444_v10, 4 }
 0x511   : > { %v5116_v21 = vperm.slane %v2682_v42, %v5016_v51  ;;  %v2729_v49 = vrot.slane %v5103_v39, 4  ;;  %v5177_v2 = vperm.slane %v2484_v6, %v5107_v48 }
 0x512   : > { %v2482_v37 = vsel %vm2421_vm5, %v2481_v18, %v5095_v50 }
 0x513   : > { %v2717_v15 = vrot.slane %v5116_v21, 4  ;;  %v2381_v29 = vpop.permute.xlu1 %2380  ;;  %v2730_v35 = vsel %vm2421_vm5, %v2729_v49, %v5113_v30  ;;  %v2507_v49 = vrot.slane %v2456_v38, 4  ;;  %v5215_v18 = vperm.slane %v2482_v37, %v5107_v48 }
 0x514   : > { %v5134_v8 = vperm.slane %v2730_v35, %v5107_v48  ;;  %v2557_v55 = vrot.slane %v2381_v29, 4 }
 0x515   : > { %v2718_v34 = vsel %vm2421_vm5, %v2717_v15, %v5128_v5  ;;  %v2560_v15 = vsel %vm2421_vm5, %v2381_v29, %v2559_v19  ;;  %v2719_v19 = vrot.slane %v5128_v5, 4 }
 0x516   : > { %v5147_v61 = vperm.slane %v2718_v34, %v5107_v48  ;;  %v2749_v22 = vrot.slane %v5134_v8, 4  ;;  %v5207_v17 = vperm.slane %v2560_v15, %v5016_v51 }
 0x518   : > { %v2741_v11 = vrot.slane %v5147_v61, 4  ;;  %v5169_v12 = vsel %vm2421_vm5, %v2749_v22, %v5153_v7 }
 0x51a   : > { %v5173_v53 = vsel %vm2421_vm5, %v2741_v11, %v5157_v46 }
 0x51b   : > { %v2353_v41 = vpop.permute.xlu1 %2352  ;;  %v2385_v52 = vpop.permute.xlu2 %2384 }
 0x51c   : > { %v2457_v4 = vrot.slane %v2353_v41, 4  ;;  %v2460_v45 = vsel %vm2421_vm5, %v2353_v41, %v2459_v47  ;;  %v2569_v42 = vrot.slane %v2385_v52, 4  ;;  %v2572_v44 = vsel %vm2421_vm5, %v2385_v52, %v2571_v9 }
 0x51d   : > { %v2468_v63 = vperm.slane %v2460_v45, %v5016_v51  ;;  %v5184_v62 = vperm.slane %v2572_v44, %v5016_v51  ;;  %v2523_v9 = vrot.slane %v2480_v59, 4 }
 0x51e   : > { %v2458_v35 = vsel %vm2421_vm5, %v2457_v4, %v5073_v0  ;;  %v2570_v40 = vsel %vm2421_vm5, %v2569_v42, %v5075_v20  ;;  %v2531_v0 = vrot.slane %v5177_v2, 4  ;;  %v2558_v20 = vsel %vm2421_vm5, %v2557_v55, %v5071_v56 }
 0x51f   : > { %v5193_v10 = vperm.slane %v2458_v35, %v5016_v51  ;;  %v2505_v32 = vrot.slane %v2468_v63, 4  ;;  %v2508_v34 = vsel %vm2421_vm5, %v2468_v63, %v2507_v49  ;;  %v5197_v58 = vperm.slane %v2570_v40, %v5016_v51 }
 0x520   : > { %v2617_v29 = vrot.slane %v5184_v62, 4  ;;  %v2516_v6 = vperm.slane %v2508_v34, %v5107_v48  ;;  %v2564_v52 = vperm.slane %v2558_v20, %v5016_v51  ;;  %v2731_v42 = vrot.slane %v5113_v30, 4 }
 0x521   : > { %v2496_v22 = vsel %vm2421_vm5, %v5193_v10, %v2495_v27  ;;  %v2605_v11 = vrot.slane %v5197_v58, 4  ;;  %v2506_v56 = vsel %vm2421_vm5, %v2505_v32, %v2456_v38  ;;  %v2527_v55 = vrot.slane %v5215_v18, 4 }
 0x522   : > { %v2532_v47 = vsel %vm2421_vm5, %v2516_v6, %v2531_v0  ;;  %v2504_v50 = vperm.slane %v2496_v22, %v5107_v48  ;;  %v2618_v41 = vsel %vm2421_vm5, %v2617_v29, %v5207_v17  ;;  %v5231_v49 = vperm.slane %v2506_v56, %v5107_v48 }
 0x523   : > { %2911 = vrot.lane.b32.xlu1 %v2532_v47, %s3730_s20  ;;  %v5227_v44 = vperm.slane %v2618_v41, %v5107_v48  ;;  %v2606_v38 = vsel %vm2421_vm5, %v2605_v11, %v2564_v52  ;;  %v2720_v63 = vsel %vm2421_vm5, %v5116_v21, %v2719_v19  ;;  %v2704_v30 = vperm.slane %v5036_v14, %v5107_v48 }
 0x524   : > { %v2524_v4 = vsel %vm2421_vm5, %v2504_v50, %v2523_v9  ;;  %v2521_v45 = vrot.slane %v2504_v50, 4  ;;  %v5242_v27 = vperm.slane %v5061_v1, %v5107_v48  ;;  %v2732_v35 = vsel %vm2421_vm5, %v5103_v39, %v2731_v42 }
 0x525   : > { %2887 = vrot.lane.b32.xlu2 %v2524_v4, %s3730_s20  ;;  %v2637_v15 = vrot.slane %v5227_v44, 4  ;;  %v2751_v40 = vrot.slane %v5153_v7, 4  ;;  %v5253_v21 = vperm.slane %v5067_v24, %v5107_v48  ;;  %v2528_v14 = vsel %vm2421_vm5, %v5231_v49, %v2527_v55 }
 0x526   : > { %v2522_v5 = vsel %vm2421_vm5, %v2521_v45, %v2480_v59  ;;  %v5245_v59 = vperm.slane %v2606_v38, %v5107_v48  ;;  %v2728_v1 = vperm.slane %v2720_v63, %v5107_v48  ;;  %v5265_v39 = vperm.slane %v2732_v35, %v5107_v48 }
 0x527   : > { %2879 = vrot.lane.b32.xlu0 %v2522_v5, %s3729_s27  ;;  %v5260_v32 = vsel %vm2421_vm5, %v2637_v15, %v5242_v27  ;;  %v2752_v24 = vsel %vm2421_vm5, %v5134_v8, %v2751_v40  ;;  %v2747_v7 = vrot.slane %v2704_v30, 4  ;;  %v2707_v29 = vrot.slane %v5123_v26, 4 }
 0x528   : > { %v2629_v34 = vrot.slane %v5245_v59, 4  ;;  %v2529_v20 = vrot.slane %v2516_v6, 4  ;;  %v2469_v22 = vrot.slane %v5137_v54, 4  ;;  %v2493_v47 = vrot.slane %v5193_v10, 4 }
 0x529   : > { %v2748_v0 = vsel %vm2421_vm5, %v2728_v1, %v2747_v7  ;;  %v2708_v11 = vsel %vm2421_vm5, %v5092_v16, %v2707_v29  ;;  %v2753_v8 = vrot.slane %v5265_v39, 4  ;;  %v2619_v54 = vrot.slane %v5207_v17, 4 }
 0x52a   : > { %v5271_v37 = vsel %vm2421_vm5, %v2629_v34, %v5253_v21  ;;  %v2470_v26 = vsel %vm2421_vm5, %v2469_v22, %v5100_v28  ;;  %v2530_v9 = vsel %vm2421_vm5, %v2529_v20, %v5177_v2  ;;  %v5287_v6 = vperm.slane %v2708_v11, %v5107_v48 }
 0x52b   : > { %2895 = vrot.lane.b32.xlu1 %v2528_v14, %s3728_s30  ;;  %v2387_v50 = vpop.permute.xlu0 %2386  ;;  %v2494_v16 = vsel %vm2421_vm5, %v2493_v47, %v5162_v13  ;;  %v2743_v56 = vrot.slane %v5157_v46, 4  ;;  %v5297_v28 = vperm.slane %v2470_v26, %v5107_v48  ;;  %v2604_v2 = vperm.slane %v5058_v3, %v5107_v48 }
 0x52c   : > { %v2793_v10 = vrot.slane %v2387_v50, 4  ;;  %v2754_v19 = vsel %vm2421_vm5, %v2753_v8, %v5287_v6  ;;  %v2607_v41 = vrot.slane %v2564_v52, 4  ;;  %v2620_v17 = vsel %vm2421_vm5, %v5184_v62, %v2619_v54 }
 0x52d   : > { %2943 = vrot.lane.b32.xlu2 %v2752_v24, %s3728_s30  ;;  %v2744_v13 = vsel %vm2421_vm5, %v5147_v61, %v2743_v56  ;;  %v5307_v4 = vperm.slane %v2494_v16, %v5107_v48  ;;  %v2519_v52 = vrot.slane %v5297_v28, 4  ;;  %v2628_v62 = vperm.slane %v2620_v17, %v5107_v48 }
 0x52e   : > { %v2608_v46 = vsel %vm2421_vm5, %v5197_v58, %v2607_v41  ;;  %v2794_v3 = vsel %vm2421_vm5, %v2793_v10, %v5085_v33  ;;  %v2795_v45 = vrot.slane %v5085_v33, 4  ;;  %v2643_v42 = vrot.slane %v2604_v2, 4 }
 0x52f   : > { %2935 = vrot.lane.b32.xlu0 %v2748_v0, %s3730_s20  ;;  %v2781_v61 = vrot.slane %v5077_v25, 4  ;;  %v2520_v5 = vsel %vm2421_vm5, %v5307_v4, %v2519_v52  ;;  %v2745_v38 = vrot.slane %v2728_v1, 4  ;;  %v2616_v55 = vperm.slane %v2608_v46, %v5107_v48 }
 0x530   : > { %v2800_v58 = vperm.slane %v2794_v3, %v5016_v51  ;;  %v2796_v63 = vsel %vm2421_vm5, %v2387_v50, %v2795_v45  ;;  %v2644_v15 = vsel %vm2421_vm5, %v2628_v62, %v2643_v42  ;;  %v2783_v34 = vrot.slane %v5069_v57, 4 }
 0x531   : > { %v2782_v33 = vsel %vm2421_vm5, %v2781_v61, %v5069_v57  ;;  %v2746_v35 = vsel %vm2421_vm5, %v2745_v38, %v2704_v30  ;;  %v2633_v40 = vrot.slane %v2616_v55, 4  ;;  %v2804_v14 = vperm.slane %v2796_v63, %v5016_v51 }
 0x532   : > { %v2829_v1 = vrot.slane %v2800_v58, 4  ;;  %v2592_v24 = vperm.slane %v5064_v31, %v5107_v48  ;;  %v2788_v7 = vperm.slane %v2782_v33, %v5016_v51  ;;  %v2784_v29 = vsel %vm2421_vm5, %v5077_v25, %v2783_v34 }
 0x533   : > { %2903 = vrot.lane.b32.xlu1 %v2530_v9, %s3729_s27  ;;  %v2639_v30 = vrot.slane %v5242_v27, 4  ;;  %v2841_v20 = vrot.slane %v2804_v14, 4  ;;  %v5345_v31 = vperm.slane %v5050_v36, %v5107_v48  ;;  %v2792_v47 = vperm.slane %v2784_v29, %v5016_v51 }
 0x534   : > { %v2634_v0 = vsel %vm2421_vm5, %v2633_v40, %v2592_v24  ;;  %v2830_v22 = vsel %vm2421_vm5, %v2829_v1, %v2788_v7  ;;  %v2635_v11 = vrot.slane %v2592_v24, 4  ;;  %v2831_v25 = vrot.slane %v2788_v7, 4  ;;  %v5397_v40 = vld [vmem:[#allocation8] sm:$0xf] }
 0x535   : > { %2951 = vrot.lane.b32.xlu2 %v2754_v19, %s3729_s27  ;;  %v2640_v57 = vsel %vm2421_vm5, %v5227_v44, %v2639_v30  ;;  %v5351_v8 = vperm.slane %v2830_v22, %v5107_v48  ;;  %v2842_v50 = vsel %vm2421_vm5, %v2841_v20, %v2792_v47  ;;  %v2855_v26 = vrot.slane %v5345_v31, 4 }
 0x536   : > { %v2636_v27 = vsel %vm2421_vm5, %v2616_v55, %v2635_v11  ;;  %v2832_v44 = vsel %vm2421_vm5, %v2800_v58, %v2831_v25  ;;  %v2641_v36 = vrot.slane %v2628_v62, 4  ;;  %v5359_v51 = vperm.slane %v5040_v43, %v5107_v48 }
 0x537   : > { %2919 = vrot.lane.b32.xlu0 %v2744_v13, %s3728_s30  ;;  %v2843_v9 = vrot.slane %v2792_v47, 4  ;;  %v2856_v54 = vsel %vm2421_vm5, %v5351_v8, %v2855_v26  ;;  %v5364_v16 = vperm.slane %v2842_v50, %v5107_v48  ;;  %v2840_v10 = vperm.slane %v2832_v44, %v5107_v48 }
 0x538   : > { %v2642_v56 = vsel %vm2421_vm5, %v2641_v36, %v2604_v2  ;;  %v2863_v41 = vrot.slane %v5359_v51, 4  ;;  %v2816_v46 = vperm.slane %v5043_v60, %v5107_v48  ;;  %v2631_v52 = vrot.slane %v5253_v21, 4 }
 0x539   : > { %v2844_v19 = vsel %vm2421_vm5, %v2804_v14, %v2843_v9  ;;  %v2857_v13 = vrot.slane %v2840_v10, 4  ;;  %v2828_v45 = vperm.slane %v5032_v23, %v5107_v48  ;;  %v2755_v21 = vrot.slane %v5287_v6, 4 }
 0x53a   : > { %v2852_v43 = vperm.slane %v2844_v19, %v5107_v48  ;;  %v2864_v17 = vsel %vm2421_vm5, %v5364_v16, %v2863_v41  ;;  %v2632_v62 = vsel %vm2421_vm5, %v5245_v59, %v2631_v52  ;;  %v2859_v60 = vrot.slane %v2816_v46, 4  ;;  %v3009_v52 = vld [vmem:[%s3935_s8 + $0x10] sm:$0xff] }
 0x53b   : > { %2871 = vrot.lane.b32.xlu1 %v2520_v5, %s3728_s30  ;;  %v2858_v3 = vsel %vm2421_vm5, %v2857_v13, %v2816_v46  ;;  %v2756_v5 = vsel %vm2421_vm5, %v5265_v39, %v2755_v21  ;;  %v2867_v59 = vrot.slane %v2828_v45, 4  ;;  %v2992_v1 = vperm.slane %v5397_v40, 1 }
 0x53c   : > { %v2865_v2 = vrot.slane %v2852_v43, 4  ;;  %v2860_v61 = vsel %vm2421_vm5, %v2840_v10, %v2859_v60  ;;  %v2517_v47 = vrot.slane %v5307_v4, 4  ;;  %v2991_v36 = vperm.slane %v5397_v40, 0 }
 0x53d   : > { %2913 = vrot.lane.b32.xlu2 %v2644_v15, %s3730_s20  ;;  %v2868_v23 = vsel %vm2421_vm5, %v2852_v43, %v2867_v59  ;;  %v3010_v59 = vld [vmem:[%s3935_s8 + $0x18] sm:$0xff] }
 0x53e   : > { %v2866_v42 = vsel %vm2421_vm5, %v2865_v2, %v2828_v45  ;;  %v2518_v26 = vsel %vm2421_vm5, %v2517_v47, %v5297_v28  ;;  %v2993_v28 = vperm.slane %v5397_v40, 2  ;;  %v2994_v45 = vperm.slane %v5397_v40, 3 }
 0x53f   : > { %2927 = vrot.lane.b32.xlu0 %v2746_v35, %s3729_s27  ;;  %v2525_v35 = vrot.slane %v5231_v49, 4 }
 0x541   : > { %v2526_v14 = vsel %vm2421_vm5, %v2525_v35, %v5215_v18 }
 0x543   : > { %2881 = vrot.lane.b32.xlu1 %v2634_v0, %s3729_s27  ;;  %v3008_v0 = vld [vmem:[%s3935_s8 + $0x8] sm:$0xff] }
 0x545   : > { %2897 = vrot.lane.b32.xlu2 %v2640_v57, %s3728_s30  ;;  %v3012_v57 = vld [vmem:[%s3935_s8 + $0x28] sm:$0xff] }
 0x547   : > { %2889 = vrot.lane.b32.xlu0 %v2636_v27, %s3730_s20 }
 0x54b   : > { %2921 = vrot.lane.b32.xlu1 %v2856_v54, %s3728_s30 }
 0x54d   : > { %2905 = vrot.lane.b32.xlu2 %v2642_v56, %s3729_s27  ;;  %v3007_v56 = vld [vmem:[%s3935_s8] sm:$0xff] }
 0x54f   : > { %2945 = vrot.lane.b32.xlu0 %v2864_v17, %s3728_s30 }
 0x553   : > { %2929 = vrot.lane.b32.xlu1 %v2858_v3, %s3729_s27 }
 0x555   : > { %2873 = vrot.lane.b32.xlu2 %v2632_v62, %s3728_s30 }
 0x557   : > { %2953 = vrot.lane.b32.xlu0 %v2866_v42, %s3729_s27 }
 0x55b   : > { %2937 = vrot.lane.b32.xlu1 %v2860_v61, %s3730_s20 }
 0x55d   : > { %2959 = vrot.lane.b32.xlu2 %v2756_v5, %s3730_s20 }
 0x55f   : > { %2961 = vrot.lane.b32.xlu0 %v2868_v23, %s3730_s20 }
 0x57f   : > { %v2888_v48 = vpop.permute.xlu2 %2887 }
 0x587   : > { %v2944_v38 = vpop.permute.xlu2 %2943 }
 0x588   : > { %v2983_v60 = vsel %vm562_vm1, %v5169_v12, %v2944_v38 }
 0x58f   : > { %v2952_v55 = vpop.permute.xlu2 %2951 }
 0x590   : > { %v2985_v61 = vsel %vm611_vm0, %v2983_v60, %v2952_v55 }
 0x595   : > { %v2912_v58 = vpop.permute.xlu1 %2911 }
 0x597   : > { %v2914_v63 = vpop.permute.xlu2 %2913 }
 0x599   : > { %v2880_v15 = vpop.permute.xlu0 %2879 }
 0x59d   : > { %v2896_v6 = vpop.permute.xlu1 %2895 }
 0x59e   : > { %v2971_v34 = vsel %vm562_vm1, %v2526_v14, %v2896_v6  ;;  %v3011_v6 = vld [vmem:[%s3935_s8 + $0x20] sm:$0xff] }
 0x59f   : > { %v2898_v33 = vpop.permute.xlu2 %2897 }
 0x5a0   : > { %v2972_v29 = vsel %vm562_vm1, %v5260_v32, %v2898_v33 }
 0x5a1   : > { %v2936_v39 = vpop.permute.xlu0 %2935 }
 0x5a5   : > { %v2904_v24 = vpop.permute.xlu1 %2903 }
 0x5a6   : > { %v2973_v7 = vsel %vm611_vm0, %v2971_v34, %v2904_v24 }
 0x5a7   : > { %v2975_v49 = vsel %vm680_vm2, %v2973_v7, %v2912_v58  ;;  %v2906_v30 = vpop.permute.xlu2 %2905  ;;  %v2861_v7 = vrot.slane %v5364_v16, 4 }
 0x5a8   : > { %v3000_v20 = vadd.f32 %v2992_v1, %v2975_v49  ;;  %v2974_v22 = vsel %vm611_vm0, %v2972_v29, %v2906_v30  ;;  %v3013_v30 = vld [vmem:[%s3935_s8 + $0x30] sm:$0xff] }
 0x5a9   : > { %v2976_v18 = vsel %vm680_vm2, %v2974_v22, %v2914_v63  ;;  %v2920_v11 = vpop.permute.xlu0 %2919 }
 0x5aa   : > { %v3016_v25 = vadd.f32 %v3008_v0, %v3000_v20  ;;  %v3004_v27 = vadd.f32 %v2992_v1, %v2976_v18  ;;  %v2977_v41 = vsel %vm562_vm1, %v5173_v53, %v2920_v11  ;;  %v2853_v1 = vrot.slane %v5351_v8, 4  ;;  %v3014_v11 = vld [vmem:[%s3935_s8 + $0x38] sm:$0xff] }
 0x5ab   : > { %v2862_v8 = vsel %vm2421_vm5, %v2861_v7, %v5359_v51 }
 0x5ac   : > { %v3024_v50 = vmax.f32 %v3016_v25, 0.0  ;;  %v3020_v44 = vadd.f32 %v3012_v57, %v3004_v27  ;;  %v2854_v24 = vsel %vm2421_vm5, %v2853_v1, %v5345_v31 }
 0x5ad   : > { %v2872_v32 = vpop.permute.xlu1 %2871 }
 0x5ae   : > { %3032 = vst [vmem:[%s5417_s23 + $0x8] sm:$0xff] %v3024_v50  ;;  %v3028_v9 = vmax.f32 %v3020_v44, 0.0  ;;  %v2965_v4 = vsel %vm562_vm1, %v2518_v26, %v2872_v32 }
 0x5af   : > { %v2967_v54 = vsel %vm611_vm0, %v2965_v4, %v2880_v15  ;;  %v2874_v10 = vpop.permute.xlu2 %2873 }
 0x5b0   : > { %3036 = vst [vmem:[%s5417_s23 + $0x28] sm:$0xff] %v3028_v9  ;;  %v2969_v19 = vsel %vm680_vm2, %v2967_v54, %v2888_v48  ;;  %v2966_v5 = vsel %vm562_vm1, %v5271_v37, %v2874_v10 }
 0x5b1   : > { %v2928_v43 = vpop.permute.xlu0 %2927  ;;  %v2999_v17 = vadd.f32 %v2991_v36, %v2969_v19 }
 0x5b2   : > { %v2979_v13 = vsel %vm611_vm0, %v2977_v41, %v2928_v43 }
 0x5b3   : > { %v2981_v46 = vsel %vm680_vm2, %v2979_v13, %v2936_v39  ;;  %v3015_v3 = vadd.f32 %v3007_v56, %v2999_v17 }
 0x5b4   : > { %v3001_v2 = vadd.f32 %v2993_v28, %v2981_v46 }
 0x5b5   : > { %v2882_v62 = vpop.permute.xlu1 %2881  ;;  %v3023_v42 = vmax.f32 %v3015_v3, 0.0 }
 0x5b6   : > { %v3017_v53 = vadd.f32 %v3009_v52, %v3001_v2  ;;  %v2968_v58 = vsel %vm611_vm0, %v2966_v5, %v2882_v62 }
 0x5b7   : > { %v2960_v21 = vpop.permute.xlu2 %2959  ;;  %3031 = vst [vmem:[%s5417_s23] sm:$0xff] %v3023_v42 }
 0x5b8   : > { %v2987_v23 = vsel %vm680_vm2, %v2985_v61, %v2960_v21  ;;  %v3025_v48 = vmax.f32 %v3017_v53, 0.0 }
 0x5b9   : > { %v3002_v63 = vadd.f32 %v2994_v45, %v2987_v23  ;;  %v2890_v15 = vpop.permute.xlu0 %2889 }
 0x5ba   : > { %v2970_v12 = vsel %vm680_vm2, %v2968_v58, %v2890_v15  ;;  %3033 = vst [vmem:[%s5417_s23 + $0x10] sm:$0xff] %v3025_v48 }
 0x5bb   : > { %v3018_v38 = vadd.f32 %v3010_v59, %v3002_v63  ;;  %v3003_v55 = vadd.f32 %v2991_v36, %v2970_v12 }
 0x5bd   : > { %v3026_v33 = vmax.f32 %v3018_v38, 0.0  ;;  %v3019_v35 = vadd.f32 %v3011_v6, %v3003_v55  ;;  %v2922_v37 = vpop.permute.xlu1 %2921 }
 0x5be   : > { %v2978_v29 = vsel %vm562_vm1, %v2854_v24, %v2922_v37 }
 0x5bf   : > { %3034 = vst [vmem:[%s5417_s23 + $0x18] sm:$0xff] %v3026_v33  ;;  %v3027_v39 = vmax.f32 %v3019_v35, 0.0 }
 0x5c1   : > { %3035 = vst [vmem:[%s5417_s23 + $0x20] sm:$0xff] %v3027_v39  ;;  %v2946_v40 = vpop.permute.xlu0 %2945 }
 0x5c2   : > { %v2984_v57 = vsel %vm562_vm1, %v2862_v8, %v2946_v40 }
 0x5c5   : > { %v2930_v14 = vpop.permute.xlu1 %2929 }
 0x5c6   : > { %v2980_v0 = vsel %vm611_vm0, %v2978_v29, %v2930_v14 }
 0x5c9   : > { %v2954_v34 = vpop.permute.xlu0 %2953 }
 0x5ca   : > { %v2986_v31 = vsel %vm611_vm0, %v2984_v57, %v2954_v34 }
 0x5cd   : > { %v2938_v49 = vpop.permute.xlu1 %2937 }
 0x5ce   : > { %v2982_v20 = vsel %vm680_vm2, %v2980_v0, %v2938_v49 }
 0x5cf   : > { %v3005_v22 = vadd.f32 %v2993_v28, %v2982_v20 }
 0x5d1   : > { %v3021_v16 = vadd.f32 %v3013_v30, %v3005_v22  ;;  %v2962_v18 = vpop.permute.xlu0 %2961 }
 0x5d2   : > { %v2988_v47 = vsel %vm680_vm2, %v2986_v31, %v2962_v18 }
 0x5d3   : > { %v3029_v25 = vmax.f32 %v3021_v16, 0.0  ;;  %v3006_v27 = vadd.f32 %v2994_v45, %v2988_v47 }
 0x5d5   : > { %3037 = vst [vmem:[%s5417_s23 + $0x30] sm:$0xff] %v3029_v25  ;;  %v3022_v51 = vadd.f32 %v3014_v11, %v3006_v27 }
 0x5d7   : > { %v3030_v50 = vmax.f32 %v3022_v51, 0.0 }
 0x5d9   : > { %3038 = vst [vmem:[%s5417_s23 + $0x38] sm:$0xff] %v3030_v50 }
 0x5da   : > { %3668 = shalt.err (!%p3665_p0)
}
 0x5db   : > { %s3734_s10 = smov 512  }
 0x5dc   : > { %3413 = dma.vmem_to_hbm [thread:$0]  (%p3846_p7), %s3053_s25, 1024, %s3055_s0, %s3040_s9, %s3734_s10, %s3734_s10, %s3728_s30  }
 0x5dd PF: > { %s3069_s1 = sand.u32 1, %s3707_s21   ;;  %p5535_p3 = scmp.ge.s32.totalorder %s3719_s24, 2 }
 0x5de   : > { %s3070_s8 = scalar_lea.sflag [#allocation4], %s3069_s1 }
 0x5df   : > { %p3433_p9 = pnand %p5535_p3, %p3805_p6 }
 0x5e1   : > { %p3434_p8 = pneg %p3433_p9 }
 0x5e3   : > { %3702 = dma.done.wait (%p3434_p8), %s3070_s8, 1024  }
 0x5e4   : > { %3704 = vsyncadd (%p3434_p8), %s3070_s8, 4294966272  ;;  %s5536_s24 = sld [smem:[#allocation18_spill]]  ;;  %s5539_s21 = smov %s3711_s22 }
 0x5e5   : > { %s5537_s27 = sld [smem:[#allocation17_spill]] }
 0x5e6   : > { %s5538_s23 = sld [smem:[#allocation19_spill]] }
 0x5ea   : > { %p21_p12 = scmp.ge.s32.totalorder %s5536_s24, 4  }
 0x5eb   : > { %s5540_s22 = smov %s5537_s27 }
 0x5ec   :  { %23 = sbr.rel (!%p21_p12) target bundleno = 12 (0xc), region = 112 }
 0x5f1   :  { %3076 = vsyncpa [#allocation3], 1 }
 0x5f2   :  { %3078 = vsyncpa [#allocation3 + $0x1], 1 }
 0x5f3   :  { %3079 = vsyncpa [#allocation6], 1 }
 0x5f4   :  { %3080 = vsyncpa [#allocation9], 1 }
 0x5f5   :  { %3081 = vsyncpa [#allocation4], 1 }
 0x5f6   :  { %3083 = vsyncpa [#allocation4 + $0x1], 1 }

</bundles_post_ra>
